<compile_context>
chip_gen: v5e
topology: v5e:2x2
jax: 0.10.0
libtpu: 0.0.40
codegen_flags: <defaults>
</compile_context>

<pallas_src>
import functools

import jax
import jax.numpy as jnp
from jax.experimental import pallas as pl


# ---------------------------------------------------------------------------
# Model hyper-parameters (small, consistent with the module's __init__)
# ---------------------------------------------------------------------------
FEATURE_SIZE = 32      # feature_size
CLUSTER_SIZE = 8       # cluster_size
OUTPUT_SIZE = 32       # output_size
EXPANSION = 2          # expansion
GROUPS = 4             # groups
DROPOUT = 0.2          # dropout (identity at inference)

EF = EXPANSION * FEATURE_SIZE                 # expanded feature size (64)
NF = EXPANSION * FEATURE_SIZE // GROUPS       # new_feature_size (16)
C = CLUSTER_SIZE                              # 8
G = GROUPS                                    # 4
O = OUTPUT_SIZE                               # 32

BATCH = 2
SEQ = 8   # number of frames M


# ---------------------------------------------------------------------------
# Pallas kernel: processes the WHOLE batch in one invocation (no grid).
# ---------------------------------------------------------------------------
def _nextvlad_kernel(x_ref, w_exp_ref, b_exp_ref, w_ac_ref, b_ac_ref,
                     cw_ref, w_fch_ref, b_fc_ref, out_ref, *, batch, seq):
    x = x_ref[...]                                                    # [B*M, F]

    # Expansion linear (needed for the aggregation path only).
    expanded = jnp.dot(x, w_exp_ref[...],
                       preferred_element_type=jnp.float32) + b_exp_ref[...]   # [B*M, EF]

    # Cluster logits + group attention in ONE matmul, computed directly from x
    # (the expansion linear is folded into w_ac/b_ac host-side), so this matmul
    # does not sit behind `expanded` on the critical path.
    # Packing order: [cluster logits (G*C) | attention (G)].
    ac = jnp.dot(x, w_ac_ref[...],
                 preferred_element_type=jnp.float32) + b_ac_ref[...]          # [B*M, G*C+G]
    logits = ac[:, :G * C]                                            # [B*M, G*C]
    att = jax.nn.sigmoid(ac[:, G * C:])                               # [B*M, G]

    # Per-group softmax * attention, batched over all B*M rows at once.
    ps = []
    for g in range(G):
        lg = logits[:, g * C:(g + 1) * C]                             # [B*M, C]
        mx = jnp.max(lg, axis=-1, keepdims=True)
        e = jnp.exp(lg - mx)
        p = e / jnp.sum(e, axis=-1, keepdims=True)
        ps.append(p * att[:, g:g + 1])                                # [B*M, C]

    rows = []
    for b in range(batch):
        r0, r1 = b * seq, (b + 1) * seq
        # Stack the G group views along the sublane (row) axis so the whole
        # per-sample aggregation becomes ONE [NF, G*M] x [G*M, C] matmul
        # instead of G transposes + G tiny K=8 matmuls. (Row order (g, m)
        # differs from the reference's (m, g), but the contraction sums over
        # all rows so the result is identical.)
        eb = jnp.concatenate(
            [expanded[r0:r1, g * NF:(g + 1) * NF] for g in range(G)], axis=0)  # [G*M, NF]
        pb = jnp.concatenate(
            [ps[g][r0:r1, :] for g in range(G)], axis=0)                       # [G*M, C]
        vlad = jnp.dot(eb.T, pb, preferred_element_type=jnp.float32)           # [NF, C]

        a_sum = jnp.sum(pb, axis=0, keepdims=True)                             # [1, C]
        vlad = vlad - a_sum * cw_ref[...]

        # L2 normalize along the NF axis (per cluster column); rsqrt runs on
        # the otherwise-idle EUP.  rsqrt(max(ss, eps^2)) == 1/max(sqrt(ss), eps)
        ss = jnp.sum(vlad * vlad, axis=0, keepdims=True)                       # [1, C]
        vlad = vlad * jax.lax.rsqrt(jnp.maximum(ss, 1e-24))

        # TODO(synk): nn.Dropout(p=0.2) omitted (inference / deterministic forward).

        # fc: one MXU matmul against the cluster-major weight [C, NF*O]
        # (w_fch[c, n*O + o] == w_fc[n*C + c, o]); the NF-major flatten of
        # `vlad` then reduces to summing the NF block-diagonal [1, O] strips
        # (cheap VPU adds) -- no in-kernel reshape, no 16 serialized matmuls.
        u = jnp.dot(vlad, w_fch_ref[...], preferred_element_type=jnp.float32)  # [NF, NF*O]
        acc = b_fc_ref[...]                                                    # [1, O]
        for n in range(NF):
            acc = acc + u[n:n + 1, n * O:(n + 1) * O]
        rows.append(acc)                                                       # [1, O]

    # Assemble [B, O] and write it with a single store (instead of B masked
    # per-row stores).
    row_ids = jax.lax.broadcasted_iota(jnp.int32, (batch, 1), 0)               # [B, 1]
    out = jnp.zeros((batch, O), jnp.float32)
    for b, row in enumerate(rows):
        out = out + jnp.where(row_ids == b, row, 0.0)
    out_ref[...] = out


def nextvlad_forward(x, mask, params):
    """x: [B, M, F] float32. mask is accepted but unused (as in the reference)."""
    del mask  # unused in the reference forward as well
    b, m, f = x.shape
    assert f == FEATURE_SIZE

    # ---- host-side weight packing (tiny; free relative to the kernel) -------
    # Fold expansion_linear into the attention / cluster weights
    # (linear-of-linear) and fuse them into a single [F, G*C + G] matmul.
    # Packing order: [cluster (no bias, but expansion bias contributes) | attention].
    w_ac = jnp.concatenate([params["w_exp"] @ params["w_cl"],
                            params["w_exp"] @ params["w_att"]], axis=1)        # [F, G*C+G]
    b_ac = jnp.concatenate([params["b_exp"] @ params["w_cl"],
                            params["b_exp"] @ params["w_att"] + params["b_att"]],
                           axis=1)                                             # [1, G*C+G]
    # fc weight regrouped cluster-major: w_fch[c, n*O + o] == w_fc[n*C + c, o]
    w_fch = params["w_fc"].reshape(NF, C, O).transpose(1, 0, 2).reshape(C, NF * O)

    x2d = x.reshape(b * m, f)   # put all B*M rows on the sublane axis

    kernel = functools.partial(_nextvlad_kernel, batch=b, seq=m)
    # No grid: a single invocation covers the whole (tiny, <100 KiB) problem.
    # Default BlockSpecs give whole-array VMEM-resident refs for every operand,
    # so weights are loaded exactly once and the [B, O] output is one store.
    return pl.pallas_call(
        kernel,
        out_shape=jax.ShapeDtypeStruct((b, O), jnp.float32),
    )(x2d, params["w_exp"], params["b_exp"], w_ac, b_ac,
      params["cw"], w_fch, params["b_fc"])


# ---------------------------------------------------------------------------
# Pure-JAX reference (mirrors the PyTorch forward exactly) for verification.
# ---------------------------------------------------------------------------
def nextvlad_reference(x, mask, p):
    del mask
    B, M, F = x.shape
    expanded = x @ p["w_exp"] + p["b_exp"][0]                         # [B, M, EF]
    att = jax.nn.sigmoid(expanded @ p["w_att"] + p["b_att"][0])       # [B, M, G]
    att = att.reshape(B, M * G, 1)
    ri = expanded.reshape(B * M, EF)
    act = (ri @ p["w_cl"]).reshape(B, M * G, C)
    act = jax.nn.softmax(act, axis=-1)
    act = act * att
    a_sum = act.sum(-2, keepdims=True)                                # [B, 1, C]
    a = a_sum * p["cw"][None]                                         # [B, NF, C]
    act_t = jnp.transpose(act, (0, 2, 1))                             # [B, C, M*G]
    ri2 = expanded.reshape(B, M * G, NF)
    vlad = jnp.matmul(act_t, ri2)                                     # [B, C, NF]
    vlad = jnp.transpose(vlad, (0, 2, 1))                             # [B, NF, C]
    vlad = vlad - a
    norm = jnp.sqrt(jnp.sum(vlad ** 2, axis=1, keepdims=True))
    vlad = vlad / jnp.maximum(norm, 1e-12)
    vlad = vlad.reshape(B, NF * C)
    return vlad @ p["w_fc"] + p["b_fc"][0]


# ---------------------------------------------------------------------------
# Deterministic parameter init (shapes from the module's __init__).
# Weights are stored already transposed to [in, out] for y = x @ W + b.
# ---------------------------------------------------------------------------
def init_params(key):
    ks = jax.random.split(key, 7)
    def init(k, shape, scale):
        return jax.random.normal(k, shape, jnp.float32) * scale
    return {
        "w_exp": init(ks[0], (FEATURE_SIZE, EF), 0.05),
        "b_exp": init(ks[1], (1, EF), 0.05),
        "w_att": init(ks[2], (EF, G), 0.05),
        "b_att": jnp.zeros((1, G), jnp.float32),
        "w_cl":  init(ks[3], (EF, G * C), 0.05),
        "cw":    init(ks[4], (NF, C), 0.01),      # cluster_weight (std=0.01)
        "w_fc":  init(ks[5], (NF * C, O), 0.05),
        "b_fc":  init(ks[6], (1, O), 0.05),
    }


if __name__ == "__main__":
    key = jax.random.PRNGKey(0)
    kx, kp = jax.random.split(key)
    x = jax.random.normal(kx, (BATCH, SEQ, FEATURE_SIZE), jnp.float32)
    mask = jnp.ones((BATCH, SEQ), jnp.float32)   # unused, as in the reference
    params = init_params(kp)

    out = jax.block_until_ready(nextvlad_forward(x, mask, params))

    ref = nextvlad_reference(x, mask, params)
    assert out.shape == (BATCH, OUTPUT_SIZE)
    assert jnp.allclose(out, ref, atol=1e-3, rtol=1e-3), (
        f"max abs err {jnp.max(jnp.abs(out - ref))}")

    print("KERNEL_OK")
</pallas_src>

<mosaic_0001>
module attributes {stable_mosaic.version = 11 : i64} {
  func.func @_nextvlad_kernel(%arg0: memref<16x32xf32, #tpu.memory_space<vmem>>, %arg1: memref<32x64xf32, #tpu.memory_space<vmem>>, %arg2: memref<1x64xf32, #tpu.memory_space<vmem>>, %arg3: memref<32x36xf32, #tpu.memory_space<vmem>>, %arg4: memref<1x36xf32, #tpu.memory_space<vmem>>, %arg5: memref<16x8xf32, #tpu.memory_space<vmem>>, %arg6: memref<8x512xf32, #tpu.memory_space<vmem>>, %arg7: memref<1x32xf32, #tpu.memory_space<vmem>>, %arg8: memref<2x32xf32, #tpu.memory_space<vmem>>) attributes {dimension_semantics = [], scalar_prefetch = 0 : i64, scratch_operands = 0 : i64, tpu.core_type = #tpu.core_type<tc>} {
    %c0 = arith.constant 0 : index
    %c0_0 = arith.constant 0 : index
    %0 = vector.load %arg0[%c0, %c0_0] : memref<16x32xf32, #tpu.memory_space<vmem>>, vector<16x32xf32>
    %c0_1 = arith.constant 0 : index
    %c0_2 = arith.constant 0 : index
    %1 = vector.load %arg1[%c0_1, %c0_2] : memref<32x64xf32, #tpu.memory_space<vmem>>, vector<32x64xf32>
    %cst = arith.constant dense<0.000000e+00> : vector<16x64xf32>
    %2 = tpu.matmul %0, %1, %cst {dimension_numbers = #tpu.dot_dimension_numbers<[1], [0], [0], [1], [0, 0, 1, 1], [], []>} : vector<16x32xf32>, vector<32x64xf32>, vector<16x64xf32> -> vector<16x64xf32>
    %c0_3 = arith.constant 0 : index
    %c0_4 = arith.constant 0 : index
    %3 = vector.load %arg2[%c0_3, %c0_4] : memref<1x64xf32, #tpu.memory_space<vmem>>, vector<1x64xf32>
    %4 = vector.broadcast %3 : vector<1x64xf32> to vector<16x64xf32>
    %5 = arith.addf %2, %4 : vector<16x64xf32>
    %c0_5 = arith.constant 0 : index
    %c0_6 = arith.constant 0 : index
    %6 = vector.load %arg3[%c0_5, %c0_6] : memref<32x36xf32, #tpu.memory_space<vmem>>, vector<32x36xf32>
    %cst_7 = arith.constant dense<0.000000e+00> : vector<16x36xf32>
    %7 = tpu.matmul %0, %6, %cst_7 {dimension_numbers = #tpu.dot_dimension_numbers<[1], [0], [0], [1], [0, 0, 1, 1], [], []>} : vector<16x32xf32>, vector<32x36xf32>, vector<16x36xf32> -> vector<16x36xf32>
    %c0_8 = arith.constant 0 : index
    %c0_9 = arith.constant 0 : index
    %8 = vector.load %arg4[%c0_8, %c0_9] : memref<1x36xf32, #tpu.memory_space<vmem>>, vector<1x36xf32>
    %9 = vector.broadcast %8 : vector<1x36xf32> to vector<16x36xf32>
    %10 = arith.addf %7, %9 : vector<16x36xf32>
    %11 = vector.extract_strided_slice %10 {offsets = [0, 0], sizes = [16, 32], strides = [1, 1]} : vector<16x36xf32> to vector<16x32xf32>
    %12 = vector.extract_strided_slice %10 {offsets = [0, 32], sizes = [16, 4], strides = [1, 1]} : vector<16x36xf32> to vector<16x4xf32>
    %13 = arith.negf %12 : vector<16x4xf32>
    %14 = math.exp %13 : vector<16x4xf32>
    %cst_10 = arith.constant 1.000000e+00 : f32
    %15 = vector.broadcast %cst_10 : f32 to vector<16x4xf32>
    %16 = arith.addf %15, %14 : vector<16x4xf32>
    %17 = arith.divf %15, %16 : vector<16x4xf32>
    %18 = vector.extract_strided_slice %11 {offsets = [0, 0], sizes = [16, 8], strides = [1, 1]} : vector<16x32xf32> to vector<16x8xf32>
    %cst_11 = arith.constant dense<0xFF800000> : vector<16xf32>
    %19 = vector.multi_reduction <maximumf>, %18, %cst_11 [1] : vector<16x8xf32> to vector<16xf32>
    %20 = vector.shape_cast %19 : vector<16xf32> to vector<16x1xf32>
    %21 = vector.broadcast %20 : vector<16x1xf32> to vector<16x8xf32>
    %22 = arith.subf %18, %21 : vector<16x8xf32>
    %23 = math.exp %22 : vector<16x8xf32>
    %cst_12 = arith.constant dense<0.000000e+00> : vector<16xf32>
    %24 = vector.multi_reduction <add>, %23, %cst_12 [1] : vector<16x8xf32> to vector<16xf32>
    %25 = vector.shape_cast %24 : vector<16xf32> to vector<16x1xf32>
    %26 = vector.broadcast %25 : vector<16x1xf32> to vector<16x8xf32>
    %27 = arith.divf %23, %26 : vector<16x8xf32>
    %28 = vector.extract_strided_slice %17 {offsets = [0, 0], sizes = [16, 1], strides = [1, 1]} : vector<16x4xf32> to vector<16x1xf32>
    %29 = vector.broadcast %28 : vector<16x1xf32> to vector<16x8xf32>
    %30 = arith.mulf %27, %29 : vector<16x8xf32>
    %31 = vector.extract_strided_slice %11 {offsets = [0, 8], sizes = [16, 8], strides = [1, 1]} : vector<16x32xf32> to vector<16x8xf32>
    %cst_13 = arith.constant dense<0xFF800000> : vector<16xf32>
    %32 = vector.multi_reduction <maximumf>, %31, %cst_13 [1] : vector<16x8xf32> to vector<16xf32>
    %33 = vector.shape_cast %32 : vector<16xf32> to vector<16x1xf32>
    %34 = vector.broadcast %33 : vector<16x1xf32> to vector<16x8xf32>
    %35 = arith.subf %31, %34 : vector<16x8xf32>
    %36 = math.exp %35 : vector<16x8xf32>
    %cst_14 = arith.constant dense<0.000000e+00> : vector<16xf32>
    %37 = vector.multi_reduction <add>, %36, %cst_14 [1] : vector<16x8xf32> to vector<16xf32>
    %38 = vector.shape_cast %37 : vector<16xf32> to vector<16x1xf32>
    %39 = vector.broadcast %38 : vector<16x1xf32> to vector<16x8xf32>
    %40 = arith.divf %36, %39 : vector<16x8xf32>
    %41 = vector.extract_strided_slice %17 {offsets = [0, 1], sizes = [16, 1], strides = [1, 1]} : vector<16x4xf32> to vector<16x1xf32>
    %42 = vector.broadcast %41 : vector<16x1xf32> to vector<16x8xf32>
    %43 = arith.mulf %40, %42 : vector<16x8xf32>
    %44 = vector.extract_strided_slice %11 {offsets = [0, 16], sizes = [16, 8], strides = [1, 1]} : vector<16x32xf32> to vector<16x8xf32>
    %cst_15 = arith.constant dense<0xFF800000> : vector<16xf32>
    %45 = vector.multi_reduction <maximumf>, %44, %cst_15 [1] : vector<16x8xf32> to vector<16xf32>
    %46 = vector.shape_cast %45 : vector<16xf32> to vector<16x1xf32>
    %47 = vector.broadcast %46 : vector<16x1xf32> to vector<16x8xf32>
    %48 = arith.subf %44, %47 : vector<16x8xf32>
    %49 = math.exp %48 : vector<16x8xf32>
    %cst_16 = arith.constant dense<0.000000e+00> : vector<16xf32>
    %50 = vector.multi_reduction <add>, %49, %cst_16 [1] : vector<16x8xf32> to vector<16xf32>
    %51 = vector.shape_cast %50 : vector<16xf32> to vector<16x1xf32>
    %52 = vector.broadcast %51 : vector<16x1xf32> to vector<16x8xf32>
    %53 = arith.divf %49, %52 : vector<16x8xf32>
    %54 = vector.extract_strided_slice %17 {offsets = [0, 2], sizes = [16, 1], strides = [1, 1]} : vector<16x4xf32> to vector<16x1xf32>
    %55 = vector.broadcast %54 : vector<16x1xf32> to vector<16x8xf32>
    %56 = arith.mulf %53, %55 : vector<16x8xf32>
    %57 = vector.extract_strided_slice %11 {offsets = [0, 24], sizes = [16, 8], strides = [1, 1]} : vector<16x32xf32> to vector<16x8xf32>
    %cst_17 = arith.constant dense<0xFF800000> : vector<16xf32>
    %58 = vector.multi_reduction <maximumf>, %57, %cst_17 [1] : vector<16x8xf32> to vector<16xf32>
    %59 = vector.shape_cast %58 : vector<16xf32> to vector<16x1xf32>
    %60 = vector.broadcast %59 : vector<16x1xf32> to vector<16x8xf32>
    %61 = arith.subf %57, %60 : vector<16x8xf32>
    %62 = math.exp %61 : vector<16x8xf32>
    %cst_18 = arith.constant dense<0.000000e+00> : vector<16xf32>
    %63 = vector.multi_reduction <add>, %62, %cst_18 [1] : vector<16x8xf32> to vector<16xf32>
    %64 = vector.shape_cast %63 : vector<16xf32> to vector<16x1xf32>
    %65 = vector.broadcast %64 : vector<16x1xf32> to vector<16x8xf32>
    %66 = arith.divf %62, %65 : vector<16x8xf32>
    %67 = vector.extract_strided_slice %17 {offsets = [0, 3], sizes = [16, 1], strides = [1, 1]} : vector<16x4xf32> to vector<16x1xf32>
    %68 = vector.broadcast %67 : vector<16x1xf32> to vector<16x8xf32>
    %69 = arith.mulf %66, %68 : vector<16x8xf32>
    %70 = vector.extract_strided_slice %5 {offsets = [0, 0], sizes = [8, 16], strides = [1, 1]} : vector<16x64xf32> to vector<8x16xf32>
    %71 = vector.extract_strided_slice %5 {offsets = [0, 16], sizes = [8, 16], strides = [1, 1]} : vector<16x64xf32> to vector<8x16xf32>
    %72 = vector.extract_strided_slice %5 {offsets = [0, 32], sizes = [8, 16], strides = [1, 1]} : vector<16x64xf32> to vector<8x16xf32>
    %73 = vector.extract_strided_slice %5 {offsets = [0, 48], sizes = [8, 16], strides = [1, 1]} : vector<16x64xf32> to vector<8x16xf32>
    %74 = tpu.concatenate %70, %71, %72, %73 in 0 : vector<8x16xf32>, vector<8x16xf32>, vector<8x16xf32>, vector<8x16xf32> -> vector<32x16xf32>
    %75 = vector.extract_strided_slice %30 {offsets = [0, 0], sizes = [8, 8], strides = [1, 1]} : vector<16x8xf32> to vector<8x8xf32>
    %76 = vector.extract_strided_slice %43 {offsets = [0, 0], sizes = [8, 8], strides = [1, 1]} : vector<16x8xf32> to vector<8x8xf32>
    %77 = vector.extract_strided_slice %56 {offsets = [0, 0], sizes = [8, 8], strides = [1, 1]} : vector<16x8xf32> to vector<8x8xf32>
    %78 = vector.extract_strided_slice %69 {offsets = [0, 0], sizes = [8, 8], strides = [1, 1]} : vector<16x8xf32> to vector<8x8xf32>
    %79 = tpu.concatenate %75, %76, %77, %78 in 0 : vector<8x8xf32>, vector<8x8xf32>, vector<8x8xf32>, vector<8x8xf32> -> vector<32x8xf32>
    %80 = tpu.transpose %74, [1, 0] : vector<32x16xf32> -> vector<16x32xf32>
    %cst_19 = arith.constant dense<0.000000e+00> : vector<16x8xf32>
    %81 = tpu.matmul %80, %79, %cst_19 {dimension_numbers = #tpu.dot_dimension_numbers<[1], [0], [0], [1], [0, 0, 1, 1], [], []>} : vector<16x32xf32>, vector<32x8xf32>, vector<16x8xf32> -> vector<16x8xf32>
    %cst_20 = arith.constant dense<0.000000e+00> : vector<8xf32>
    %82 = vector.multi_reduction <add>, %79, %cst_20 [0] : vector<32x8xf32> to vector<8xf32>
    %83 = vector.shape_cast %82 : vector<8xf32> to vector<1x8xf32>
    %c0_21 = arith.constant 0 : index
    %c0_22 = arith.constant 0 : index
    %84 = vector.load %arg5[%c0_21, %c0_22] : memref<16x8xf32, #tpu.memory_space<vmem>>, vector<16x8xf32>
    %85 = vector.broadcast %83 : vector<1x8xf32> to vector<16x8xf32>
    %86 = arith.mulf %85, %84 : vector<16x8xf32>
    %87 = arith.subf %81, %86 : vector<16x8xf32>
    %88 = arith.mulf %87, %87 : vector<16x8xf32>
    %cst_23 = arith.constant dense<0.000000e+00> : vector<8xf32>
    %89 = vector.multi_reduction <add>, %88, %cst_23 [0] : vector<16x8xf32> to vector<8xf32>
    %90 = vector.shape_cast %89 : vector<8xf32> to vector<1x8xf32>
    %cst_24 = arith.constant 1.000000e-24 : f32
    %91 = vector.broadcast %cst_24 : f32 to vector<1x8xf32>
    %92 = arith.maximumf %90, %91 : vector<1x8xf32>
    %93 = math.rsqrt %92 : vector<1x8xf32>
    %94 = vector.broadcast %93 : vector<1x8xf32> to vector<16x8xf32>
    %95 = arith.mulf %87, %94 : vector<16x8xf32>
    %c0_25 = arith.constant 0 : index
    %c0_26 = arith.constant 0 : index
    %96 = vector.load %arg6[%c0_25, %c0_26] : memref<8x512xf32, #tpu.memory_space<vmem>>, vector<8x512xf32>
    %cst_27 = arith.constant dense<0.000000e+00> : vector<16x512xf32>
    %97 = tpu.matmul %95, %96, %cst_27 {dimension_numbers = #tpu.dot_dimension_numbers<[1], [0], [0], [1], [0, 0, 1, 1], [], []>} : vector<16x8xf32>, vector<8x512xf32>, vector<16x512xf32> -> vector<16x512xf32>
    %c0_28 = arith.constant 0 : index
    %c0_29 = arith.constant 0 : index
    %98 = vector.load %arg7[%c0_28, %c0_29] : memref<1x32xf32, #tpu.memory_space<vmem>>, vector<1x32xf32>
    %99 = vector.extract_strided_slice %97 {offsets = [0, 0], sizes = [1, 32], strides = [1, 1]} : vector<16x512xf32> to vector<1x32xf32>
    %100 = arith.addf %98, %99 : vector<1x32xf32>
    %101 = vector.extract_strided_slice %97 {offsets = [1, 32], sizes = [1, 32], strides = [1, 1]} : vector<16x512xf32> to vector<1x32xf32>
    %102 = arith.addf %100, %101 : vector<1x32xf32>
    %103 = vector.extract_strided_slice %97 {offsets = [2, 64], sizes = [1, 32], strides = [1, 1]} : vector<16x512xf32> to vector<1x32xf32>
    %104 = arith.addf %102, %103 : vector<1x32xf32>
    %105 = vector.extract_strided_slice %97 {offsets = [3, 96], sizes = [1, 32], strides = [1, 1]} : vector<16x512xf32> to vector<1x32xf32>
    %106 = arith.addf %104, %105 : vector<1x32xf32>
    %107 = vector.extract_strided_slice %97 {offsets = [4, 128], sizes = [1, 32], strides = [1, 1]} : vector<16x512xf32> to vector<1x32xf32>
    %108 = arith.addf %106, %107 : vector<1x32xf32>
    %109 = vector.extract_strided_slice %97 {offsets = [5, 160], sizes = [1, 32], strides = [1, 1]} : vector<16x512xf32> to vector<1x32xf32>
    %110 = arith.addf %108, %109 : vector<1x32xf32>
    %111 = vector.extract_strided_slice %97 {offsets = [6, 192], sizes = [1, 32], strides = [1, 1]} : vector<16x512xf32> to vector<1x32xf32>
    %112 = arith.addf %110, %111 : vector<1x32xf32>
    %113 = vector.extract_strided_slice %97 {offsets = [7, 224], sizes = [1, 32], strides = [1, 1]} : vector<16x512xf32> to vector<1x32xf32>
    %114 = arith.addf %112, %113 : vector<1x32xf32>
    %115 = vector.extract_strided_slice %97 {offsets = [8, 256], sizes = [1, 32], strides = [1, 1]} : vector<16x512xf32> to vector<1x32xf32>
    %116 = arith.addf %114, %115 : vector<1x32xf32>
    %117 = vector.extract_strided_slice %97 {offsets = [9, 288], sizes = [1, 32], strides = [1, 1]} : vector<16x512xf32> to vector<1x32xf32>
    %118 = arith.addf %116, %117 : vector<1x32xf32>
    %119 = vector.extract_strided_slice %97 {offsets = [10, 320], sizes = [1, 32], strides = [1, 1]} : vector<16x512xf32> to vector<1x32xf32>
    %120 = arith.addf %118, %119 : vector<1x32xf32>
    %121 = vector.extract_strided_slice %97 {offsets = [11, 352], sizes = [1, 32], strides = [1, 1]} : vector<16x512xf32> to vector<1x32xf32>
    %122 = arith.addf %120, %121 : vector<1x32xf32>
    %123 = vector.extract_strided_slice %97 {offsets = [12, 384], sizes = [1, 32], strides = [1, 1]} : vector<16x512xf32> to vector<1x32xf32>
    %124 = arith.addf %122, %123 : vector<1x32xf32>
    %125 = vector.extract_strided_slice %97 {offsets = [13, 416], sizes = [1, 32], strides = [1, 1]} : vector<16x512xf32> to vector<1x32xf32>
    %126 = arith.addf %124, %125 : vector<1x32xf32>
    %127 = vector.extract_strided_slice %97 {offsets = [14, 448], sizes = [1, 32], strides = [1, 1]} : vector<16x512xf32> to vector<1x32xf32>
    %128 = arith.addf %126, %127 : vector<1x32xf32>
    %129 = vector.extract_strided_slice %97 {offsets = [15, 480], sizes = [1, 32], strides = [1, 1]} : vector<16x512xf32> to vector<1x32xf32>
    %130 = arith.addf %128, %129 : vector<1x32xf32>
    %131 = vector.extract_strided_slice %5 {offsets = [8, 0], sizes = [8, 16], strides = [1, 1]} : vector<16x64xf32> to vector<8x16xf32>
    %132 = vector.extract_strided_slice %5 {offsets = [8, 16], sizes = [8, 16], strides = [1, 1]} : vector<16x64xf32> to vector<8x16xf32>
    %133 = vector.extract_strided_slice %5 {offsets = [8, 32], sizes = [8, 16], strides = [1, 1]} : vector<16x64xf32> to vector<8x16xf32>
    %134 = vector.extract_strided_slice %5 {offsets = [8, 48], sizes = [8, 16], strides = [1, 1]} : vector<16x64xf32> to vector<8x16xf32>
    %135 = tpu.concatenate %131, %132, %133, %134 in 0 : vector<8x16xf32>, vector<8x16xf32>, vector<8x16xf32>, vector<8x16xf32> -> vector<32x16xf32>
    %136 = vector.extract_strided_slice %30 {offsets = [8, 0], sizes = [8, 8], strides = [1, 1]} : vector<16x8xf32> to vector<8x8xf32>
    %137 = vector.extract_strided_slice %43 {offsets = [8, 0], sizes = [8, 8], strides = [1, 1]} : vector<16x8xf32> to vector<8x8xf32>
    %138 = vector.extract_strided_slice %56 {offsets = [8, 0], sizes = [8, 8], strides = [1, 1]} : vector<16x8xf32> to vector<8x8xf32>
    %139 = vector.extract_strided_slice %69 {offsets = [8, 0], sizes = [8, 8], strides = [1, 1]} : vector<16x8xf32> to vector<8x8xf32>
    %140 = tpu.concatenate %136, %137, %138, %139 in 0 : vector<8x8xf32>, vector<8x8xf32>, vector<8x8xf32>, vector<8x8xf32> -> vector<32x8xf32>
    %141 = tpu.transpose %135, [1, 0] : vector<32x16xf32> -> vector<16x32xf32>
    %cst_30 = arith.constant dense<0.000000e+00> : vector<16x8xf32>
    %142 = tpu.matmul %141, %140, %cst_30 {dimension_numbers = #tpu.dot_dimension_numbers<[1], [0], [0], [1], [0, 0, 1, 1], [], []>} : vector<16x32xf32>, vector<32x8xf32>, vector<16x8xf32> -> vector<16x8xf32>
    %cst_31 = arith.constant dense<0.000000e+00> : vector<8xf32>
    %143 = vector.multi_reduction <add>, %140, %cst_31 [0] : vector<32x8xf32> to vector<8xf32>
    %144 = vector.shape_cast %143 : vector<8xf32> to vector<1x8xf32>
    %c0_32 = arith.constant 0 : index
    %c0_33 = arith.constant 0 : index
    %145 = vector.load %arg5[%c0_32, %c0_33] : memref<16x8xf32, #tpu.memory_space<vmem>>, vector<16x8xf32>
    %146 = vector.broadcast %144 : vector<1x8xf32> to vector<16x8xf32>
    %147 = arith.mulf %146, %145 : vector<16x8xf32>
    %148 = arith.subf %142, %147 : vector<16x8xf32>
    %149 = arith.mulf %148, %148 : vector<16x8xf32>
    %cst_34 = arith.constant dense<0.000000e+00> : vector<8xf32>
    %150 = vector.multi_reduction <add>, %149, %cst_34 [0] : vector<16x8xf32> to vector<8xf32>
    %151 = vector.shape_cast %150 : vector<8xf32> to vector<1x8xf32>
    %cst_35 = arith.constant 1.000000e-24 : f32
    %152 = vector.broadcast %cst_35 : f32 to vector<1x8xf32>
    %153 = arith.maximumf %151, %152 : vector<1x8xf32>
    %154 = math.rsqrt %153 : vector<1x8xf32>
    %155 = vector.broadcast %154 : vector<1x8xf32> to vector<16x8xf32>
    %156 = arith.mulf %148, %155 : vector<16x8xf32>
    %c0_36 = arith.constant 0 : index
    %c0_37 = arith.constant 0 : index
    %157 = vector.load %arg6[%c0_36, %c0_37] : memref<8x512xf32, #tpu.memory_space<vmem>>, vector<8x512xf32>
    %cst_38 = arith.constant dense<0.000000e+00> : vector<16x512xf32>
    %158 = tpu.matmul %156, %157, %cst_38 {dimension_numbers = #tpu.dot_dimension_numbers<[1], [0], [0], [1], [0, 0, 1, 1], [], []>} : vector<16x8xf32>, vector<8x512xf32>, vector<16x512xf32> -> vector<16x512xf32>
    %c0_39 = arith.constant 0 : index
    %c0_40 = arith.constant 0 : index
    %159 = vector.load %arg7[%c0_39, %c0_40] : memref<1x32xf32, #tpu.memory_space<vmem>>, vector<1x32xf32>
    %160 = vector.extract_strided_slice %158 {offsets = [0, 0], sizes = [1, 32], strides = [1, 1]} : vector<16x512xf32> to vector<1x32xf32>
    %161 = arith.addf %159, %160 : vector<1x32xf32>
    %162 = vector.extract_strided_slice %158 {offsets = [1, 32], sizes = [1, 32], strides = [1, 1]} : vector<16x512xf32> to vector<1x32xf32>
    %163 = arith.addf %161, %162 : vector<1x32xf32>
    %164 = vector.extract_strided_slice %158 {offsets = [2, 64], sizes = [1, 32], strides = [1, 1]} : vector<16x512xf32> to vector<1x32xf32>
    %165 = arith.addf %163, %164 : vector<1x32xf32>
    %166 = vector.extract_strided_slice %158 {offsets = [3, 96], sizes = [1, 32], strides = [1, 1]} : vector<16x512xf32> to vector<1x32xf32>
    %167 = arith.addf %165, %166 : vector<1x32xf32>
    %168 = vector.extract_strided_slice %158 {offsets = [4, 128], sizes = [1, 32], strides = [1, 1]} : vector<16x512xf32> to vector<1x32xf32>
    %169 = arith.addf %167, %168 : vector<1x32xf32>
    %170 = vector.extract_strided_slice %158 {offsets = [5, 160], sizes = [1, 32], strides = [1, 1]} : vector<16x512xf32> to vector<1x32xf32>
    %171 = arith.addf %169, %170 : vector<1x32xf32>
    %172 = vector.extract_strided_slice %158 {offsets = [6, 192], sizes = [1, 32], strides = [1, 1]} : vector<16x512xf32> to vector<1x32xf32>
    %173 = arith.addf %171, %172 : vector<1x32xf32>
    %174 = vector.extract_strided_slice %158 {offsets = [7, 224], sizes = [1, 32], strides = [1, 1]} : vector<16x512xf32> to vector<1x32xf32>
    %175 = arith.addf %173, %174 : vector<1x32xf32>
    %176 = vector.extract_strided_slice %158 {offsets = [8, 256], sizes = [1, 32], strides = [1, 1]} : vector<16x512xf32> to vector<1x32xf32>
    %177 = arith.addf %175, %176 : vector<1x32xf32>
    %178 = vector.extract_strided_slice %158 {offsets = [9, 288], sizes = [1, 32], strides = [1, 1]} : vector<16x512xf32> to vector<1x32xf32>
    %179 = arith.addf %177, %178 : vector<1x32xf32>
    %180 = vector.extract_strided_slice %158 {offsets = [10, 320], sizes = [1, 32], strides = [1, 1]} : vector<16x512xf32> to vector<1x32xf32>
    %181 = arith.addf %179, %180 : vector<1x32xf32>
    %182 = vector.extract_strided_slice %158 {offsets = [11, 352], sizes = [1, 32], strides = [1, 1]} : vector<16x512xf32> to vector<1x32xf32>
    %183 = arith.addf %181, %182 : vector<1x32xf32>
    %184 = vector.extract_strided_slice %158 {offsets = [12, 384], sizes = [1, 32], strides = [1, 1]} : vector<16x512xf32> to vector<1x32xf32>
    %185 = arith.addf %183, %184 : vector<1x32xf32>
    %186 = vector.extract_strided_slice %158 {offsets = [13, 416], sizes = [1, 32], strides = [1, 1]} : vector<16x512xf32> to vector<1x32xf32>
    %187 = arith.addf %185, %186 : vector<1x32xf32>
    %188 = vector.extract_strided_slice %158 {offsets = [14, 448], sizes = [1, 32], strides = [1, 1]} : vector<16x512xf32> to vector<1x32xf32>
    %189 = arith.addf %187, %188 : vector<1x32xf32>
    %190 = vector.extract_strided_slice %158 {offsets = [15, 480], sizes = [1, 32], strides = [1, 1]} : vector<16x512xf32> to vector<1x32xf32>
    %191 = arith.addf %189, %190 : vector<1x32xf32>
    %192 = tpu.iota {dimensions = array<i32: 0>} : vector<2x1xi32>
    %cst_41 = arith.constant 0.000000e+00 : f32
    %193 = vector.broadcast %cst_41 : f32 to vector<2x32xf32>
    %c0_i32 = arith.constant 0 : i32
    %194 = vector.broadcast %c0_i32 : i32 to vector<2x1xi32>
    %195 = arith.cmpi eq, %192, %194 : vector<2x1xi32>
    %cst_42 = arith.constant 0.000000e+00 : f32
    %196 = vector.shape_cast %195 : vector<2x1xi1> to vector<2x1xi1>
    %197 = vector.broadcast %196 : vector<2x1xi1> to vector<2x32xi1>
    %198 = vector.shape_cast %130 : vector<1x32xf32> to vector<1x32xf32>
    %199 = vector.broadcast %198 : vector<1x32xf32> to vector<2x32xf32>
    %200 = vector.broadcast %cst_42 : f32 to vector<2x32xf32>
    %201 = arith.select %197, %199, %200 : vector<2x32xi1>, vector<2x32xf32>
    %202 = arith.addf %193, %201 : vector<2x32xf32>
    %c1_i32 = arith.constant 1 : i32
    %203 = vector.broadcast %c1_i32 : i32 to vector<2x1xi32>
    %204 = arith.cmpi eq, %192, %203 : vector<2x1xi32>
    %cst_43 = arith.constant 0.000000e+00 : f32
    %205 = vector.shape_cast %204 : vector<2x1xi1> to vector<2x1xi1>
    %206 = vector.broadcast %205 : vector<2x1xi1> to vector<2x32xi1>
    %207 = vector.shape_cast %191 : vector<1x32xf32> to vector<1x32xf32>
    %208 = vector.broadcast %207 : vector<1x32xf32> to vector<2x32xf32>
    %209 = vector.broadcast %cst_43 : f32 to vector<2x32xf32>
    %210 = arith.select %206, %208, %209 : vector<2x32xi1>, vector<2x32xf32>
    %211 = arith.addf %202, %210 : vector<2x32xf32>
    %c0_44 = arith.constant 0 : index
    %c0_45 = arith.constant 0 : index
    %212 = vector.load %arg8[%c0_44, %c0_45] : memref<2x32xf32, #tpu.memory_space<vmem>>, vector<2x32xf32>
    tpu.vector_store %arg8[%c0_44, %c0_45], %211 {strides = array<i32>} : memref<2x32xf32, #tpu.memory_space<vmem>>, vector<2x32xf32>,
    return
  }
}

</mosaic_0001>

<bundles_post_ra>
// kernel: tpu_custom_call.1
= control target key start
LH: loop header
LB: loop body
LE: loop exit
PB: predicated region body
PF: predicated region fallthrough
CT: control target
= control target key end

     0   :  { %13 = vsyncpa [#allocation3], 0  ;;  %s1673_s0 = inlined_call_operand.vmem [shape: f32[16,32], index: 0, kind: input, shape index: {}]   ;;  %s1674_s1 = inlined_call_operand.hbm [shape: f32[32,64], index: 1, kind: input, shape index: {}]   ;;  %s1675_s2 = inlined_call_operand.vmem [shape: f32[1,64], index: 2, kind: input, shape index: {}]   ;;  %s1676_s3 = inlined_call_operand.hbm [shape: f32[32,36], index: 3, kind: input, shape index: {}]   ;;  %s1677_s4 = inlined_call_operand.vmem [shape: f32[1,36], index: 4, kind: input, shape index: {}]   ;;  %s1678_s5 = inlined_call_operand.vmem [shape: f32[16,8], index: 5, kind: input, shape index: {}]   ;;  %s1679_s6 = inlined_call_operand.hbm [shape: f32[8,512], index: 6, kind: input, shape index: {}]   ;;  %s1680_s7 = inlined_call_operand.vmem [shape: f32[1,32], index: 7, kind: input, shape index: {}]   ;;  %s1681_s8 = inlined_call_operand.hbm [shape: f32[2,32], index: 8, kind: output, shape index: {}]  }
   0x1   :  { %14 = vsyncpa [#allocation6], 0 }
   0x2   :  { %15 = vsyncpa [#allocation4], 0  ;;  %s37_s29 = sshll.u32 %s1676_s3, 4  ;;  %s1328_s30 = smov [#allocation5]   ;;  %s38_s29 = int_to_ptr.hbm [resolvable:$true] %s37_s29 }
   0x3   :  { %s39_s9 = sshll.u32 %s1328_s30, 4  ;;  %s22_s12 = sshll.u32 %s1674_s1, 4  ;;  %s40_s9 = int_to_ptr.vmem [resolvable:$true] %s39_s9  ;;  %s23_s12 = int_to_ptr.hbm [resolvable:$true] %s22_s12 }
   0x4   :  { %s1329_s13 = smov 128   ;;  %s1330_s14 = smov 8  }
   0x5   :  { %45 = dma.hbm_to_vmem [thread:$0]  %s38_s29, 512, %s40_s9, [#allocation6], %s1329_s13, %s1329_s13, %s1330_s14  }
   0x6   :  { %s1331_s15 = smov [#allocation2]   ;;  %s55_s19 = sshll.u32 %s1679_s6, 4  ;;  %s56_s19 = int_to_ptr.hbm [resolvable:$true] %s55_s19 }
   0x7   :  { %s24_s16 = sshll.u32 %s1331_s15, 4  ;;  %s1332_s3 = smov [#allocation7]   ;;  %s25_s16 = int_to_ptr.vmem [resolvable:$true] %s24_s16 }
   0x8   :  { %30 = dma.hbm_to_vmem [thread:$0]  %s23_s12, 512, %s25_s16, [#allocation3], %s1329_s13, %s1329_s13, %s1330_s14  }
   0x9   :  { %s57_s20 = sshll.u32 %s1332_s3, 4  ;;  %s58_s20 = int_to_ptr.vmem [resolvable:$true] %s57_s20 }
   0xa   :  { %60 = dma.hbm_to_vmem [thread:$0]  %s56_s19, 512, %s58_s20, [#allocation6]  }
   0xb   :  { %1322 = dma.done.wait [#allocation3], 512  }
   0xc   :  { %1323 = vsyncadd [#allocation3], 4294966784 }
   0xd   :  { %1324 = dma.done.wait [#allocation6], 1024  }
   0xe   :  { %1325 = vsyncadd [#allocation6], 4294966272  ;;  %v118_v0 = vld [vmem:[#allocation5 + $0x18] sm:$0xff]  ;;  %v117_v1 = vld [vmem:[#allocation5 + $0x10] sm:$0xff]  ;;  %vm85_vm0 = vcmask 261120   ;;  %v1333_v11 = vmov 35  }
   0xf   :  { %135 = vmatpush.msra.mxu1 %v118_v0  ;;  %v116_v2 = vld [vmem:[#allocation5 + $0x8] sm:$0xff]  ;;  %v80_v3 = vld [vmem:[#allocation2 + $0x18] sm:$0xff]  ;;  %v79_v4 = vld [vmem:[#allocation2 + $0x10] sm:$0xff]  ;;  %1171 = vset.pattern.permute.xlu1 %v1333_v11  ;;  %vm379_vm1 = vcmask 261312   ;;  %vm245_vm2 = vcmask 130112   ;;  %vm312_vm3 = vcmask 195712  }
  0x10   :  { %104 = vmatpush.msra.mxu0 %v80_v3  ;;  %v115_v5 = vld [vmem:[#allocation5] sm:$0xff]  ;;  %v78_v6 = vld [vmem:[#allocation2 + $0x8] sm:$0xff]  ;;  %v75_v7 = vld [vmem:[%s1673_s0] sm:$0xff]  ;;  %vm184_vm4 = vcmask 64512   ;;  %s1334_s25 = smov 112   ;;  %v1336_v38 = vmov 32  }
  0x11   :  { %136 = vmatpush.msra.mxu1 %v117_v1  ;;  %v77_v8 = vld [vmem:[#allocation2] sm:$0xff]  ;;  %v1180_v10 = vld [vmem:[%s1677_s4] ss:$0 sm:$0xff]  ;;  %1174 = vset.pattern.permute.xlu0 %v1336_v38  ;;  %v1337_v39 = vmov 34   ;;  %s1338_s26 = smov 96   ;;  %v1339_v41 = vmov 33  }
  0x12   :  { %105 = vmatpush.msra.mxu0 %v79_v4  ;;  %v76_v9 = vld [vmem:[%s1673_s0 + $0x8] sm:$0xff]  ;;  %v1425_v19 = vld [vmem:[%s1675_s2] ss:$0 sm:$0xff]  ;;  %s1335_s2 = smov 80   ;;  %s1340_s27 = smov 104  }
  0x13   :  { %137 = vmatpush.msra.mxu1 %v116_v2  ;;  %s1341_s28 = smov 120   ;;  %s1343_s11 = smov 32  }
  0x14   :  { %106 = vmatpush.msra.mxu0 %v78_v6  ;;  %s1116_s17 = sshll.u32 %s1681_s8, 4  ;;  %s1117_s17 = int_to_ptr.hbm [resolvable:$true] %s1116_s17 }
  0x15   :  { %138 = vmatpush.msra.mxu1 %v115_v5 }
  0x16   :  { %1129 = vmatmul.msk.f32.vlgmr.msra.gmra.mxu1 %vm85_vm0, %v75_v7  ;;  %107 = vmatpush.msra.mxu0 %v77_v8 }
  0x17   :  { %1127 = vmatmul.msk.f32.vlgmr.msra.gmra.mxu0 %vm85_vm0, %v75_v7 }
  0x1e   :  { %1130 = vmatmul.msk.f32.gmra.mxu1 %vm85_vm0, %v76_v9 }
  0x1f   :  { %1128 = vmatmul.msk.f32.gmra.mxu0 %vm85_vm0, %v76_v9 }
  0x93   :  { %v140_v12 = vpop.f32.mrf.mxu1 }
  0x94   :  { %v1413_v13 = vadd.f32 %v1180_v10, %v140_v12  ;;  %v109_v20 = vpop.f32.mrf.mxu0 }
  0x95   :  { %v1428_v22 = vadd.f32 %v1425_v19, %v109_v20 }
  0x96   :  { %v380_v14 = vsel %vm379_vm1, %v1413_v13, -inf  ;;  %v246_v15 = vsel %vm245_vm2, %v1413_v13, -inf  ;;  %v1131_v16 = vmul.f32 -1.442695, %v1413_v13  ;;  %v313_v17 = vsel %vm312_vm3, %v1413_v13, -inf }
  0x97   :  { %381 = vmax.xlane.f32.xlu0 %v380_v14  ;;  %247 = vmax.xlane.f32.xlu1 %v246_v15  ;;  %v185_v24 = vsel %vm184_vm4, %v1413_v13, -inf }
  0x98   :  { %1182 = vpow2.f32 %v1131_v16  ;;  %447 = vrot.lane.b32.xlu2 %v1428_v22, %s1334_s25 }
  0x9b   :  { %v143_v23 = vpop.f32.mrf.mxu1 }
  0x9c   :  { %v1434_v26 = vadd.f32 %v1180_v10, %v143_v23 }
  0x9e   :  { %v1183_v18 = vpop.eup %1182  ;;  %v383_v29 = vsel %vm379_vm1, %v1434_v26, -inf  ;;  %v316_v37 = vsel %vm312_vm3, %v1434_v26, -inf  ;;  %v249_v40 = vsel %vm245_vm2, %v1434_v26, -inf }
  0x9f   :  { %314 = vmax.xlane.f32.xlu0 %v313_v17  ;;  %v152_v21 = vadd.f32 1.0, %v1183_v18 }
  0xa0   :  { %453 = vrot.lane.b32.xlu2 %v1428_v22, %s1335_s2 }
  0xa1   :  { %1184 = vrcp.f32 %v152_v21  ;;  %v165_v30 = vand.u32 2147483648, %v152_v21  ;;  %v163_v32 = vand.u32 2147483647, %v152_v21  ;;  %vm159_vm6 = vweird.f32 %v152_v21 }
  0xa3   :  { %v166_v34 = vor.u32 1.1754944e-38, %v165_v30  ;;  %vm164_vm8 = vcmp.eq.f32.partialorder %v163_v32, 8.507059e+37 }
  0xa7   :  { %186 = vmax.xlane.f32.xlu0 %v185_v24  ;;  %v1185_v25 = vpop.eup %1184 }
  0xa8   :  { %v155_v27 = vmul.f32 %v1185_v25, %v152_v21  ;;  %vm160_vm5 = vweird.f32 %v1185_v25  ;;  %v1132_v21 = vmul.f32 -1.442695, %v1434_v26 }
  0xa9   :  { %vm161_vm7 = vmor %vm159_vm6, %vm160_vm5 }
  0xaa   :  { %v156_v28 = vsub.f32 1.0, %v155_v27 }
  0xac   :  { %v157_v31 = vmul.f32 %v1185_v25, %v156_v28 }
  0xae   :  { %v158_v33 = vadd.f32 %v1185_v25, %v157_v31 }
  0xaf   :  { %384 = vmax.xlane.f32.xlu0 %v383_v29 }
  0xb0   :  { %v162_v35 = vsel %vm161_vm7, %v1185_v25, %v158_v33 }
  0xb1   :  { %v167_v36 = vsel %vm164_vm8, %v166_v34, %v162_v35 }
  0xb2   :  { %437 = vperm.xlu1 %1171, %v167_v36  }
  0xb7   :  { %317 = vmax.xlane.f32.xlu0 %v316_v37 }
  0xba   :  { %1172 = vset.pattern.permute.xlu1 %v1337_v39 }
  0xbb   :  { %370 = vperm.xlu1 %1172, %v167_v36  }
  0xbf   :  { %250 = vmax.xlane.f32.xlu0 %v249_v40 }
  0xc3   :  { %1173 = vset.pattern.permute.xlu1 %v1339_v41 }
  0xd3   :  { %450 = vrot.lane.b32.xlu0 %v1428_v22, %s1338_s26 }
  0xdb   :  { %235 = vperm.xlu0 %1174, %v167_v36  }
  0xe3   :  { %1176 = vset.pattern.permute.xlu0 %v1337_v39 }
  0xf2   :  { %v1481_v7 = vpop.permute.xlu2 %447 }
  0xfa   :  { %v1483_v8 = vpop.permute.xlu2 %453 }
 0x10a   :  { %v382_v42 = vpop.xlane.xlu0 %381  ;;  %v248_v47 = vpop.xlane.xlu1 %247 }
 0x10b   :  { %v386_v43 = vsub.f32 %v1413_v13, %v382_v42  ;;  %v252_v50 = vsub.f32 %v1413_v13, %v248_v47 }
 0x10d   :  { %v388_v44 = vmul.f32 1.442695, %v386_v43  ;;  %v254_v52 = vmul.f32 1.442695, %v252_v50 }
 0x10f   :  { %1186 = vpow2.f32 %v388_v44 }
 0x112   :  { %v315_v45 = vpop.xlane.xlu0 %314 }
 0x113   :  { %v319_v46 = vsub.f32 %v1413_v13, %v315_v45 }
 0x115   :  { %v1450_v48 = vpop.eup %1186  ;;  %v321_v49 = vmul.f32 1.442695, %v319_v46 }
 0x116   :  { %394 = vrot.lane.b32.xlu1 %v1450_v48, %s1340_s27 }
 0x117   :  { %1188 = vpow2.f32 %v321_v49 }
 0x118   :  { %1190 = vpow2.f32 %v254_v52 }
 0x11a   :  { %v187_v51 = vpop.xlane.xlu0 %186 }
 0x11b   :  { %v191_v63 = vsub.f32 %v1413_v13, %v187_v51 }
 0x11d   :  { %v1455_v53 = vpop.eup %1188  ;;  %v193_v0 = vmul.f32 1.442695, %v191_v63 }
 0x11e   :  { %303 = vperm.xlu1 %1173, %v167_v36   ;;  %327 = vrot.lane.b32.xlu2 %v1455_v53, %s1334_s25  ;;  %v1459_v55 = vpop.eup %1190 }
 0x122   :  { %v385_v54 = vpop.xlane.xlu0 %384 }
 0x123   :  { %v387_v4 = vsub.f32 %v1434_v26, %v385_v54 }
 0x124   :  { %v1485_v9 = vpop.permute.xlu1 %437 }
 0x125   :  { %v390_v5 = vmul.f32 1.442695, %v387_v4 }
 0x126   :  { %260 = vrot.lane.b32.xlu2 %v1459_v55, %s1341_s28  ;;  %1175 = vset.pattern.permute.xlu1 %v1333_v11 }
 0x12a   :  { %v318_v56 = vpop.xlane.xlu0 %317 }
 0x12b   :  { %v320_v57 = vsub.f32 %v1434_v26, %v318_v56 }
 0x12d   :  { %v323_v58 = vmul.f32 1.442695, %v320_v57  ;;  %v1488_v13 = vpop.permute.xlu1 %370 }
 0x12f   :  { %1192 = vpow2.f32 %v323_v58 }
 0x132   :  { %v251_v59 = vpop.xlane.xlu0 %250 }
 0x133   :  { %v253_v60 = vsub.f32 %v1434_v26, %v251_v59 }
 0x135   :  { %v1466_v61 = vpop.eup %1192  ;;  %v256_v62 = vmul.f32 1.442695, %v253_v60 }
 0x136   :  { %329 = vrot.lane.b32.xlu2 %v1466_v61, %s1334_s25 }
 0x137   :  { %1194 = vpow2.f32 %v256_v62 }
 0x138   :  { %1196 = vpow2.f32 %v193_v0 }
 0x139   :  { %1198 = vpow2.f32 %v390_v5 }
 0x13d   :  { %v1471_v1 = vpop.eup %1194 }
 0x13e   :  { %262 = vrot.lane.b32.xlu0 %v1471_v1, %s1341_s28  ;;  %v1197_v2 = vpop.eup %1196 }
 0x13f   :  { %v197_v3 = vsel %vm184_vm4, %v1197_v2, 0.0  ;;  %v1477_v6 = vpop.eup %1198 }
 0x145   :  { %v1495_v25 = vpop.permute.xlu0 %450 }
 0x148   :  { %198 = vadd.xlane.f32.xlu1 %v197_v3 }
 0x14d   :  { %v236_v39 = vpop.permute.xlu0 %235 }
 0x161   :  { %396 = vrot.lane.b32.xlu1 %v1477_v6, %s1340_s27 }
 0x178   :  { %v328_v10 = vpop.permute.xlu2 %327 }
 0x179   :  { %v333_v12 = vsel %vm184_vm4, %v328_v10, 0.0 }
 0x17a   :  { %334 = vadd.xlane.f32.xlu0 %v333_v12 }
 0x180   :  { %v261_v14 = vpop.permute.xlu2 %260 }
 0x181   :  { %v266_v15 = vsel %vm184_vm4, %v261_v14, 0.0 }
 0x182   :  { %267 = vadd.xlane.f32.xlu0 %v266_v15 }
 0x188   :  { %v395_v16 = vpop.permute.xlu1 %394 }
 0x189   :  { %v400_v17 = vsel %vm184_vm4, %v395_v16, 0.0 }
 0x18a   :  { %401 = vadd.xlane.f32.xlu2 %v400_v17 }
 0x190   :  { %v1492_v18 = vpop.permute.xlu1 %303  ;;  %v330_v60 = vpop.permute.xlu2 %329 }
 0x1b0   :  { %v1500_v49 = vpop.permute.xlu0 %262 }
 0x1bb   :  { %v199_v20 = vpop.xlane.xlu1 %198 }
 0x1bc   :  { %1200 = vrcp.f32 %v199_v20  ;;  %v214_v28 = vand.u32 2147483648, %v199_v20  ;;  %v212_v30 = vand.u32 2147483647, %v199_v20  ;;  %vm208_vm10 = vweird.f32 %v199_v20 }
 0x1bd   :  { %1202 = vpow2.f32 %v1132_v21 }
 0x1be   :  { %v215_v33 = vor.u32 1.1754944e-38, %v214_v28  ;;  %vm213_vm12 = vcmp.eq.f32.partialorder %v212_v30, 8.507059e+37 }
 0x1c2   :  { %v1201_v23 = vpop.eup %1200 }
 0x1c3   :  { %v204_v24 = vmul.f32 %v1201_v23, %v199_v20  ;;  %vm209_vm9 = vweird.f32 %v1201_v23  ;;  %v1203_v32 = vpop.eup %1202 }
 0x1c4   :  { %vm210_vm11 = vmor %vm208_vm10, %vm209_vm9  ;;  %v153_v36 = vadd.f32 1.0, %v1203_v32 }
 0x1c5   :  { %v205_v27 = vsub.f32 1.0, %v204_v24 }
 0x1c6   :  { %1204 = vrcp.f32 %v153_v36  ;;  %vm174_vm13 = vweird.f32 %v153_v36  ;;  %v180_v50 = vand.u32 2147483648, %v153_v36  ;;  %v178_v52 = vand.u32 2147483647, %v153_v36 }
 0x1c7   :  { %v206_v29 = vmul.f32 %v1201_v23, %v205_v27 }
 0x1c8   :  { %v181_v54 = vor.u32 1.1754944e-38, %v180_v50  ;;  %vm179_vm1 = vcmp.eq.f32.partialorder %v178_v52, 8.507059e+37 }
 0x1c9   :  { %v207_v31 = vadd.f32 %v1201_v23, %v206_v29 }
 0x1cb   :  { %v211_v34 = vsel %vm210_vm11, %v1201_v23, %v207_v31 }
 0x1cc   :  { %v216_v35 = vsel %vm213_vm12, %v215_v33, %v211_v34  ;;  %v1205_v44 = vpop.eup %1204 }
 0x1cd   :  { %v217_v37 = vmul.f32 %v1197_v2, %v216_v35  ;;  %v170_v45 = vmul.f32 %v1205_v44, %v153_v36  ;;  %vm175_vm14 = vweird.f32 %v1205_v44 }
 0x1ce   :  { %vm176_vm15 = vmor %vm174_vm13, %vm175_vm14 }
 0x1cf   :  { %v1497_v40 = vmul.f32 %v236_v39, %v217_v37  ;;  %v171_v46 = vsub.f32 1.0, %v170_v45 }
 0x1d1   :  { %v172_v47 = vmul.f32 %v1205_v44, %v171_v46 }
 0x1d3   :  { %v397_v42 = vpop.permute.xlu1 %396  ;;  %v173_v51 = vadd.f32 %v1205_v44, %v172_v47 }
 0x1d4   :  { %v403_v43 = vsel %vm184_vm4, %v397_v42, 0.0 }
 0x1d5   :  { %404 = vadd.xlane.f32.xlu1 %v403_v43  ;;  %v177_v56 = vsel %vm176_vm15, %v1205_v44, %v173_v51 }
 0x1d6   :  { %v1502_v58 = vsel %vm179_vm1, %v181_v54, %v177_v56 }
 0x1ed   :  { %v335_v57 = vpop.xlane.xlu0 %334 }
 0x1ee   :  { %1206 = vrcp.f32 %v335_v57  ;;  %441 = vperm.xlu1 %1175, %v1502_v58   ;;  %v350_v3 = vand.u32 2147483648, %v335_v57  ;;  %v348_v4 = vand.u32 2147483647, %v335_v57  ;;  %vm344_vm3 = vweird.f32 %v335_v57 }
 0x1f0   :  { %v351_v12 = vor.u32 1.1754944e-38, %v350_v3  ;;  %vm349_vm6 = vcmp.eq.f32.partialorder %v348_v4, 8.507059e+37 }
 0x1f4   :  { %v1207_v59 = vpop.eup %1206 }
 0x1f5   :  { %v340_v62 = vmul.f32 %v1207_v59, %v335_v57  ;;  %v268_v63 = vpop.xlane.xlu0 %267  ;;  %vm345_vm2 = vweird.f32 %v1207_v59 }
 0x1f6   :  { %1208 = vrcp.f32 %v268_v63  ;;  %vm346_vm5 = vmor %vm344_vm3, %vm345_vm2  ;;  %v283_v21 = vand.u32 2147483648, %v268_v63  ;;  %v281_v27 = vand.u32 2147483647, %v268_v63  ;;  %vm277_vm8 = vweird.f32 %v268_v63 }
 0x1f7   :  { %v341_v0 = vsub.f32 1.0, %v340_v62 }
 0x1f8   :  { %v284_v31 = vor.u32 1.1754944e-38, %v283_v21  ;;  %vm282_vm10 = vcmp.eq.f32.partialorder %v281_v27, 8.507059e+37 }
 0x1f9   :  { %v342_v2 = vmul.f32 %v1207_v59, %v341_v0 }
 0x1fb   :  { %v343_v5 = vadd.f32 %v1207_v59, %v342_v2 }
 0x1fc   :  { %v1209_v10 = vpop.eup %1208 }
 0x1fd   :  { %v273_v14 = vmul.f32 %v1209_v10, %v268_v63  ;;  %v402_v15 = vpop.xlane.xlu2 %401  ;;  %v347_v16 = vsel %vm346_vm5, %v1207_v59, %v343_v5  ;;  %vm278_vm7 = vweird.f32 %v1209_v10 }
 0x1fe   :  { %1210 = vrcp.f32 %v402_v15  ;;  %v352_v20 = vsel %vm349_vm6, %v351_v12, %v347_v16  ;;  %vm279_vm9 = vmor %vm277_vm8, %vm278_vm7  ;;  %v415_v39 = vand.u32 2147483647, %v402_v15  ;;  %vm411_vm12 = vweird.f32 %v402_v15 }
 0x1ff   :  { %v274_v17 = vsub.f32 1.0, %v273_v14  ;;  %v353_v23 = vmul.f32 %v1455_v53, %v352_v20  ;;  %v417_v53 = vand.u32 2147483648, %v402_v15 }
 0x200   :  { %vm416_vm14 = vcmp.eq.f32.partialorder %v415_v39, 8.507059e+37 }
 0x201   :  { %v275_v24 = vmul.f32 %v1209_v10, %v274_v17  ;;  %v377_v28 = vmul.f32 %v1488_v13, %v353_v23  ;;  %v418_v43 = vor.u32 1.1754944e-38, %v417_v53 }
 0x203   :  { %v276_v29 = vadd.f32 %v1209_v10, %v275_v24  ;;  %461 = vrot.lane.b32.xlu2 %v377_v28, %s1334_s25 }
 0x204   :  { %v1211_v30 = vpop.eup %1210 }
 0x205   :  { %v407_v32 = vmul.f32 %v1211_v30, %v402_v15  ;;  %v280_v33 = vsel %vm279_vm9, %v1209_v10, %v276_v29  ;;  %vm412_vm11 = vweird.f32 %v1211_v30 }
 0x206   :  { %v285_v34 = vsel %vm282_vm10, %v284_v31, %v280_v33  ;;  %vm413_vm13 = vmor %vm411_vm12, %vm412_vm11 }
 0x207   :  { %v408_v35 = vsub.f32 1.0, %v407_v32  ;;  %v286_v36 = vmul.f32 %v1459_v55, %v285_v34  ;;  %v188_v55 = vsel %vm184_vm4, %v1434_v26, -inf }
 0x209   :  { %v409_v37 = vmul.f32 %v1211_v30, %v408_v35  ;;  %v310_v13 = vmul.f32 %v1492_v18, %v286_v36  ;;  %v336_v18 = vsel %vm184_vm4, %v330_v60, 0.0 }
 0x20b   :  { %v410_v42 = vadd.f32 %v1211_v30, %v409_v37  ;;  %457 = vrot.lane.b32.xlu2 %v310_v13, %s1341_s28 }
 0x20d   :  { %v414_v44 = vsel %vm413_vm13, %v1211_v30, %v410_v42 }
 0x20e   :  { %v419_v45 = vsel %vm416_vm14, %v418_v43, %v414_v44 }
 0x20f   :  { %v420_v46 = vmul.f32 %v1450_v48, %v419_v45  ;;  %v269_v48 = vsel %vm184_vm4, %v1500_v49, 0.0  ;;  %v529_v49 = vsel %vm184_vm4, %v1497_v40, 0.0 }
 0x211   :  { %v444_v47 = vmul.f32 %v1485_v9, %v420_v46 }
 0x213   :  { %465 = vrot.lane.b32.xlu0 %v444_v47, %s1340_s27 }
 0x231   :  { %468 = vxpose.xlu2.b32.start [1/4] (short) (narrow) %v1428_v22, 16  ;;  %v112_v22 = vpop.f32.mrf.mxu0 }
 0x239   :  { %469 = vxpose.xlu2.b32.cont [2/4] (short) (narrow) %v1481_v7, 16  ;;  %v1525_v7 = vadd.f32 %v1425_v19, %v112_v22 }
 0x23d   :  { %189 = vmax.xlane.f32.xlu0 %v188_v55 }
 0x241   :  { %470 = vxpose.xlu2.b32.cont [3/4] (short) (narrow) %v1495_v25, 16 }
 0x245   :  { %337 = vadd.xlane.f32.xlu0 %v336_v18 }
 0x248   :  { %v405_v56 = vpop.xlane.xlu1 %404 }
 0x249   :  { %471 = vxpose.xlu2.b32.end [4/4] (short) (narrow) %v1483_v8, 16  ;;  %1212 = vrcp.f32 %v405_v56  ;;  %vm426_vm2 = vweird.f32 %v405_v56  ;;  %v432_v14 = vand.u32 2147483648, %v405_v56  ;;  %v430_v16 = vand.u32 2147483647, %v405_v56 }
 0x24b   :  { %v433_v27 = vor.u32 1.1754944e-38, %v432_v14  ;;  %vm431_vm7 = vcmp.eq.f32.partialorder %v430_v16, 8.507059e+37 }
 0x24d   :  { %270 = vadd.xlane.f32.xlu0 %v269_v48 }
 0x24f   :  { %v1213_v63 = vpop.eup %1212 }
 0x250   :  { %v422_v2 = vmul.f32 %v1213_v63, %v405_v56  ;;  %vm427_vm15 = vweird.f32 %v1213_v63 }
 0x251   :  { %vm428_vm3 = vmor %vm426_vm2, %vm427_vm15 }
 0x252   :  { %v423_v3 = vsub.f32 1.0, %v422_v2 }
 0x25d   :  { %v462_v9 = vpop.permute.xlu2 %461 }
 0x25e   :  { %v532_v50 = vsel %vm184_vm4, %v462_v9, 0.0 }
 0x260   :  { %v442_v31 = vpop.permute.xlu1 %441 }
 0x261   :  { %374 = vperm.xlu0 %1176, %v1502_v58  }
 0x265   :  { %v458_v8 = vpop.permute.xlu2 %457 }
 0x266   :  { %v530_v25 = vsel %vm184_vm4, %v458_v8, 0.0 }
 0x267   :  { %v531_v19 = vadd.f32 %v530_v25, %v529_v49 }
 0x269   :  { %772 = vrot.lane.b32.xlu0 %v1525_v7, %s1334_s25 }
 0x26a   :  { %1178 = vset.pattern.permute.xlu0 %v1336_v38  ;;  %v533_v38 = vadd.f32 %v532_v50, %v531_v19 }
 0x271   :  { %775 = vrot.lane.b32.xlu0 %v1525_v7, %s1338_s26 }
 0x279   :  { %778 = vrot.lane.b32.xlu0 %v1525_v7, %s1335_s2 }
 0x281   :  { %240 = vperm.xlu0 %1178, %v1502_v58  }
 0x285   :  { %v466_v51 = vpop.permute.xlu0 %465 }
 0x286   :  { %v534_v52 = vsel %vm184_vm4, %v466_v51, 0.0  ;;  %518 = vmatpush.msra.mxu2 %v466_v51 }
 0x287   :  { %v1540_v54 = vadd.f32 %v534_v52, %v533_v38 }
 0x288   :  { %519 = vmatpush.msra.mxu2 %v462_v9 }
 0x289   :  { %v536_v9 = vrot.slane %v1540_v54, 4 }
 0x28a   :  { %520 = vmatpush.msra.mxu2 %v458_v8 }
 0x28b   :  { %v537_v8 = vadd.f32 %v536_v9, %v1540_v54  ;;  %v1572_v54 = vld [vmem:[%s1678_s5] sm:$0xff] }
 0x28c   :  { %521 = vmatpush.msra.mxu2 %v1497_v40 }
 0x28d   :  { %v538_v19 = vrot.slane %v537_v8, 2 }
 0x28f   :  { %v539_v50 = vadd.f32 %v538_v19, %v537_v8 }
 0x291   :  { %v540_v38 = vrot.slane %v539_v50, 1 }
 0x293   :  { %v541_v52 = vadd.f32 %v540_v38, %v539_v50 }
 0x2ab   :  { %1177 = vset.pattern.permute.xlu2 %v1339_v41 }
 0x2b0   :  { %v190_v57 = vpop.xlane.xlu0 %189 }
 0x2b1   :  { %v192_v59 = vsub.f32 %v1434_v26, %v190_v57  ;;  %v424_v26 = vmul.f32 %v1213_v63, %v423_v3  ;;  %v544_v57 = vmul.f32 %v1572_v54, %v541_v52 }
 0x2b2   :  { %307 = vperm.xlu2 %1177, %v1502_v58  }
 0x2b3   :  { %v195_v60 = vmul.f32 1.442695, %v192_v59  ;;  %v425_v12 = vadd.f32 %v1213_v63, %v424_v26  ;;  %v1578_v59 = vld [vmem:[%s1678_s5 + $0x8] sm:$0xff]  ;;  %s1342_s5 = smov 64  }
 0x2b5   :  { %1214 = vpow2.f32 %v195_v60  ;;  %v429_v23 = vsel %vm428_vm3, %v1213_v63, %v425_v12  ;;  %v574_v12 = vld [vmem:[#allocation7 + $0x10] sm:$0xff] }
 0x2b6   :  { %v434_v29 = vsel %vm431_vm7, %v433_v27, %v429_v23  ;;  %641 = vmatpush.msrb.mxu0 %v574_v12  ;;  %v573_v27 = vld [vmem:[#allocation7 + $0x8] sm:$0xff] }
 0x2b7   :  { %v435_v32 = vmul.f32 %v1477_v6, %v434_v29 }
 0x2b8   :  { %v338_v62 = vpop.xlane.xlu0 %337  ;;  %938 = vmatpush.msra.mxu0 %v573_v27 }
 0x2b9   :  { %1216 = vrcp.f32 %v338_v62  ;;  %v365_v15 = vand.u32 2147483648, %v338_v62  ;;  %vm359_vm5 = vweird.f32 %v338_v62  ;;  %v363_v17 = vand.u32 2147483647, %v338_v62 }
 0x2ba   :  { %v445_v36 = vmul.f32 %v442_v31, %v435_v32 }
 0x2bb   :  { %v1546_v0 = vpop.eup %1214  ;;  %v366_v28 = vor.u32 1.1754944e-38, %v365_v15  ;;  %vm364_vm8 = vcmp.eq.f32.partialorder %v363_v17, 8.507059e+37 }
 0x2bc   :  { %v200_v40 = vsel %vm184_vm4, %v1546_v0, 0.0 }
 0x2bd   :  { %201 = vadd.xlane.f32.xlu1 %v200_v40 }
 0x2bf   :  { %v1217_v41 = vpop.eup %1216 }
 0x2c0   :  { %v355_v4 = vmul.f32 %v1217_v41, %v338_v62  ;;  %vm360_vm1 = vweird.f32 %v1217_v41  ;;  %v271_v20 = vpop.xlane.xlu0 %270  ;;  %v545_v62 = vmul.f32 %v1578_v59, %v541_v52 }
 0x2c1   :  { %vm361_vm6 = vmor %vm359_vm5, %vm360_vm1  ;;  %1218 = vrcp.f32 %v271_v20  ;;  %v298_v43 = vand.u32 2147483648, %v271_v20  ;;  %vm292_vm10 = vweird.f32 %v271_v20  ;;  %v296_v44 = vand.u32 2147483647, %v271_v20 }
 0x2c2   :  { %v356_v5 = vsub.f32 1.0, %v355_v4 }
 0x2c3   :  { %v299_v47 = vor.u32 1.1754944e-38, %v298_v43  ;;  %vm297_vm12 = vcmp.eq.f32.partialorder %v296_v44, 8.507059e+37 }
 0x2c4   :  { %v357_v10 = vmul.f32 %v1217_v41, %v356_v5 }
 0x2c6   :  { %v358_v58 = vadd.f32 %v1217_v41, %v357_v10  ;;  %v572_v10 = vld [vmem:[#allocation7] sm:$0xff] }
 0x2c7   :  { %v1219_v37 = vpop.eup %1218  ;;  %597 = vmatpush.msra.mxu3 %v572_v10 }
 0x2c8   :  { %v362_v24 = vsel %vm361_vm6, %v1217_v41, %v358_v58  ;;  %v288_v39 = vmul.f32 %v1219_v37, %v271_v20  ;;  %vm293_vm9 = vweird.f32 %v1219_v37  ;;  %v575_v58 = vld [vmem:[#allocation7 + $0x18] sm:$0xff] }
 0x2c9   :  { %v367_v30 = vsel %vm364_vm8, %v366_v28, %v362_v24  ;;  %vm294_vm11 = vmor %vm292_vm10, %vm293_vm9  ;;  %663 = vmatpush.msrb.mxu1 %v575_v58  ;;  %619 = vmatpush.msrb.mxu3 %v573_v27  ;;  %vm1107_vm9 = vcmask 254976  }
 0x2ca   :  { %v484_v21 = vpop.trf.xlu2  ;;  %v368_v33 = vmul.f32 %v1466_v61, %v367_v30  ;;  %v289_v13 = vsub.f32 1.0, %v288_v39 }
 0x2cb   :  { %1133 = vmatmul.msk.f32.vlgmr.msra.gmra.mxu2 %vm85_vm0, %v484_v21  ;;  %960 = vmatpush.msra.mxu1 %v574_v12 }
 0x2cc   :  { %v290_v6 = vmul.f32 %v1219_v37, %v289_v13 }
 0x2ce   :  { %v291_v61 = vadd.f32 %v1219_v37, %v290_v6 }
 0x2d0   :  { %v295_v46 = vsel %vm294_vm11, %v1219_v37, %v291_v61 }
 0x2d1   :  { %v300_v55 = vsel %vm297_vm12, %v299_v47, %v295_v46 }
 0x2d2   :  { %v485_v34 = vpop.trf.xlu2  ;;  %v301_v18 = vmul.f32 %v1471_v1, %v300_v55 }
 0x2d3   :  { %v375_v35 = vpop.permute.xlu0 %374  ;;  %1134 = vmatmul.msk.f32.gmra.mxu2 %vm85_vm0, %v485_v34 }
 0x2d4   :  { %v378_v53 = vmul.f32 %v375_v35, %v368_v33 }
 0x2d6   :  { %790 = vrot.lane.b32.xlu1 %v445_v36, %s1340_s27  ;;  %786 = vrot.lane.b32.xlu0 %v378_v53, %s1334_s25 }
 0x2db   :  { %v773_v42 = vpop.permute.xlu0 %772 }
 0x2e3   :  { %v776_v45 = vpop.permute.xlu0 %775 }
 0x2f8   :  { %793 = vxpose.xlu0.b32.start [1/4] (short) (narrow) %v1525_v7, 16  ;;  %v779_v7 = vpop.permute.xlu0 %778 }
 0x300   :  { %794 = vxpose.xlu0.b32.cont [2/4] (short) (narrow) %v773_v42, 16  ;;  %v1561_v49 = vpop.permute.xlu0 %240 }
 0x308   :  { %795 = vxpose.xlu0.b32.cont [3/4] (short) (narrow) %v776_v45, 16 }
 0x30c   :  { %v308_v48 = vpop.permute.xlu2 %307 }
 0x30d   :  { %v311_v22 = vmul.f32 %v308_v48, %v301_v18 }
 0x30f   :  { %782 = vrot.lane.b32.xlu1 %v311_v22, %s1341_s28 }
 0x310   :  { %796 = vxpose.xlu0.b32.end [4/4] (short) (narrow) %v779_v7, 16 }
 0x330   :  { %v202_v25 = vpop.xlane.xlu1 %201 }
 0x331   :  { %1220 = vrcp.f32 %v202_v25  ;;  %v229_v31 = vand.u32 2147483648, %v202_v25  ;;  %vm223_vm14 = vweird.f32 %v202_v25  ;;  %v227_v33 = vand.u32 2147483647, %v202_v25 }
 0x333   :  { %v230_v53 = vor.u32 1.1754944e-38, %v229_v31  ;;  %vm228_vm1 = vcmp.eq.f32.partialorder %v227_v33, 8.507059e+37 }
 0x337   :  { %v1221_v15 = vpop.eup %1220 }
 0x338   :  { %v219_v17 = vmul.f32 %v1221_v15, %v202_v25  ;;  %vm224_vm13 = vweird.f32 %v1221_v15 }
 0x339   :  { %vm225_vm15 = vmor %vm223_vm14, %vm224_vm13 }
 0x33a   :  { %v220_v23 = vsub.f32 1.0, %v219_v17 }
 0x33c   :  { %v221_v29 = vmul.f32 %v1221_v15, %v220_v23 }
 0x33e   :  { %v222_v30 = vadd.f32 %v1221_v15, %v221_v29 }
 0x340   :  { %v226_v35 = vsel %vm225_vm15, %v1221_v15, %v222_v30 }
 0x341   :  { %v231_v39 = vsel %vm228_vm1, %v230_v53, %v226_v35 }
 0x342   :  { %v232_v42 = vmul.f32 %v1546_v0, %v231_v39 }
 0x344   :  { %v244_v44 = vmul.f32 %v1561_v49, %v232_v42 }
 0x346   :  { %v854_v0 = vsel %vm184_vm4, %v244_v44, 0.0 }
 0x348   :  { %v1563_v51 = vpop.permute.xlu1 %790  ;;  %v1566_v1 = vpop.permute.xlu0 %786 }
 0x349   :  { %843 = vmatpush.msrb.mxu2 %v1563_v51  ;;  %v857_v47 = vsel %vm184_vm4, %v1566_v1, 0.0  ;;  %v859_v18 = vsel %vm184_vm4, %v1563_v51, 0.0 }
 0x34b   :  { %844 = vmatpush.msrb.mxu2 %v1566_v1 }
 0x34e   :  { %v523_v56 = vpop.f32.mrf.mxu2 }
 0x34f   :  { %v546_v60 = vsub.f32 %v523_v56, %v544_v57 }
 0x351   :  { %v548_v2 = vmul.f32 %v546_v60, %v546_v60 }
 0x353   :  { %v550_v3 = vsel %vm184_vm4, %v548_v2, 0.0 }
 0x356   :  { %v526_v63 = vpop.f32.mrf.mxu2 }
 0x357   :  { %v1581_v40 = vsub.f32 %v526_v63, %v545_v62 }
 0x359   :  { %v549_v41 = vmul.f32 %v1581_v40, %v1581_v40 }
 0x35b   :  { %v551_v4 = vsel %vm184_vm4, %v549_v41, 0.0 }
 0x35c   :  { %v552_v5 = vadd.f32 %v551_v4, %v550_v3 }
 0x35e   :  { %v553_v26 = vrot.slane %v552_v5, 4 }
 0x360   :  { %v554_v14 = vadd.f32 %v553_v26, %v552_v5 }
 0x362   :  { %v555_v16 = vrot.slane %v554_v14, 2 }
 0x364   :  { %v556_v20 = vadd.f32 %v555_v16, %v554_v14 }
 0x366   :  { %v557_v21 = vrot.slane %v556_v20, 1 }
 0x368   :  { %v558_v24 = vadd.f32 %v557_v21, %v556_v20 }
 0x36a   :  { %v559_v28 = vmax.f32 %v558_v24, 1e-24 }
 0x36c   :  { %1222 = vrsqrt.f32 %v559_v28  ;;  %vm566_vm3 = vweird.f32 %v559_v28 }
 0x372   :  { %v1223_v32 = vpop.eup %1222 }
 0x373   :  { %v561_v34 = vmul.f32 %v1223_v32, %v559_v28  ;;  %vm567_vm2 = vweird.f32 %v1223_v32 }
 0x374   :  { %vm568_vm5 = vmor %vm566_vm3, %vm567_vm2 }
 0x375   :  { %v562_v36 = vmul.f32 %v1223_v32, %v561_v34 }
 0x377   :  { %1179 = vset.pattern.permute.xlu0 %v1333_v11  ;;  %v563_v37 = vmul.f32 0.5, %v562_v36 }
 0x379   :  { %v564_v13 = vsub.f32 1.5, %v563_v37 }
 0x37b   :  { %v565_v6 = vmul.f32 %v1223_v32, %v564_v13 }
 0x37d   :  { %v569_v61 = vsel %vm568_vm5, %v1223_v32, %v565_v6 }
 0x37e   :  { %v570_v43 = vmul.f32 %v569_v61, %v546_v60  ;;  %v571_v48 = vmul.f32 %v569_v61, %v1581_v40 }
 0x380   :  { %1135 = vmatmul.msk.f32.vlgmr.msra.gmra.mxu3 %vm184_vm4, %v570_v43  ;;  %1139 = vmatmul.msk.f32.vlgmr.msrb.gmra.mxu0 %vm184_vm4, %v570_v43 }
 0x381   :  { %1141 = vmatmul.msk.f32.vlgmr.msrb.gmra.mxu1 %vm184_vm4, %v570_v43  ;;  %v783_v11 = vpop.permute.xlu1 %782  ;;  %916 = vmatpush.msra.mxu3 %v572_v10 }
 0x382   :  { %v855_v45 = vsel %vm184_vm4, %v783_v11, 0.0  ;;  %845 = vmatpush.msrb.mxu2 %v783_v11 }
 0x383   :  { %v856_v46 = vadd.f32 %v855_v45, %v854_v0 }
 0x384   :  { %846 = vmatpush.msrb.mxu2 %v244_v44 }
 0x385   :  { %v858_v55 = vadd.f32 %v857_v47, %v856_v46 }
 0x386   :  { %982 = vmatpush.msra.mxu2 %v575_v58 }
 0x387   :  { %v860_v22 = vadd.f32 %v859_v18, %v858_v55 }
 0x388   :  { %1136 = vmatmul.msk.f32.gmra.mxu3 %vm184_vm4, %v571_v48  ;;  %1140 = vmatmul.msk.f32.gmra.mxu0 %vm184_vm4, %v571_v48 }
 0x389   :  { %1142 = vmatmul.msk.f32.gmra.mxu1 %vm184_vm4, %v571_v48  ;;  %v861_v19 = vrot.slane %v860_v22, 4 }
 0x38b   :  { %v862_v1 = vadd.f32 %v861_v19, %v860_v22 }
 0x38d   :  { %v863_v38 = vrot.slane %v862_v1, 2 }
 0x38f   :  { %v864_v57 = vadd.f32 %v863_v38, %v862_v1 }
 0x390   :  { %1137 = vmatmul.msk.f32.vlgmr.msrb.gmra.mxu3 %vm184_vm4, %v570_v43 }
 0x391   :  { %v865_v60 = vrot.slane %v864_v57, 1 }
 0x393   :  { %v866_v2 = vadd.f32 %v865_v60, %v864_v57 }
 0x395   :  { %v867_v41 = vmul.f32 %v866_v2, %v1572_v54  ;;  %v868_v5 = vmul.f32 %v866_v2, %v1578_v59 }
 0x398   :  { %1138 = vmatmul.msk.f32.gmra.mxu3 %vm184_vm4, %v571_v48 }
 0x39c   :  { %v809_v7 = vpop.trf.xlu0 }
 0x39d   :  { %1143 = vmatmul.msk.f32.vlgmr.msrb.gmra.mxu2 %vm85_vm0, %v809_v7 }
 0x3a4   :  { %v810_v9 = vpop.trf.xlu0 }
 0x3a5   :  { %1144 = vmatmul.msk.f32.gmra.mxu2 %vm85_vm0, %v810_v9 }
 0x3fd   :  { %v643_v8 = vpop.f32.mrf.mxu0 }
 0x3fe   :  { %v665_v25 = vpop.f32.mrf.mxu1 }
 0x403   :  { %v1607_v49 = vpop.f32.mrf.mxu3 }
 0x404   :  { %673 = vst [vmem:[#allocation1] sm:$0xff] %v1607_v49 }
 0x405   :  { %v1623_v28 = vpop.f32.mrf.mxu0 }
 0x406   :  { %v667_v42 = vpop.f32.mrf.mxu1 }
 0x40b   :  { %v675_v50 = vld [vmem:[#allocation1 + $0x1] ss:$9 sm:$0xff]  ;;  %v602_v51 = vpop.f32.mrf.mxu3 }
 0x40c   :  { %680 = vst [vmem:[#allocation1] sm:$0xff] %v1607_v49  ;;  %676 = vrot.lane.b32.xlu1 %v675_v50, %s1338_s26 }
 0x413   :  { %v682_v52 = vld [vmem:[#allocation1 + $0x2] ss:$9 sm:$0xff]  ;;  %v621_v56 = vpop.f32.mrf.mxu3 }
 0x414   :  { %687 = vst [vmem:[#allocation1] sm:$0xff] %v1607_v49  ;;  %683 = vrot.lane.b32.xlu1 %v682_v52, %s1342_s5 }
 0x41b   :  { %v689_v62 = vld [vmem:[#allocation1 + $0x3] ss:$9 sm:$0xff]  ;;  %v624_v63 = vpop.f32.mrf.mxu3 }
 0x41c   :  { %695 = vst [vmem:[#allocation1] sm:$0xff] %v621_v56  ;;  %690 = vrot.lane.b32.xlu2 %v689_v62, %s1343_s11 }
 0x420   :  { %v848_v40 = vpop.f32.mrf.mxu2 }
 0x421   :  { %v869_v4 = vsub.f32 %v848_v40, %v867_v41 }
 0x423   :  { %v1616_v3 = vld [vmem:[#allocation1 + $0x4] ss:$9 sm:$0xff]  ;;  %v871_v10 = vmul.f32 %v869_v4, %v869_v4 }
 0x424   :  { %700 = vst [vmem:[#allocation1] sm:$0xff] %v621_v56 }
 0x425   :  { %v873_v15 = vsel %vm184_vm4, %v871_v10, 0.0 }
 0x428   :  { %v851_v26 = vpop.f32.mrf.mxu2 }
 0x429   :  { %v870_v12 = vsub.f32 %v851_v26, %v868_v5 }
 0x42b   :  { %v872_v58 = vmul.f32 %v870_v12, %v870_v12  ;;  %v702_v14 = vld [vmem:[#allocation1 + $0x5] ss:$9 sm:$0xff] }
 0x42c   :  { %707 = vst [vmem:[#allocation1] sm:$0xff] %v621_v56  ;;  %703 = vrot.lane.b32.xlu2 %v702_v14, %s1338_s26 }
 0x42d   :  { %v874_v16 = vsel %vm184_vm4, %v872_v58, 0.0 }
 0x42e   :  { %v875_v17 = vadd.f32 %v874_v16, %v873_v15 }
 0x430   :  { %v876_v54 = vrot.slane %v875_v17, 4 }
 0x432   :  { %v877_v20 = vadd.f32 %v876_v54, %v875_v17  ;;  %v670_v17 = vld [vmem:[%s1680_s7] sm:$0x1]  ;;  %s1344_s7 = smov [#allocation8]  }
 0x433   :  { %v709_v21 = vld [vmem:[#allocation1 + $0x6] ss:$9 sm:$0xff]  ;;  %s1114_s14 = sshll.u32 %s1344_s7, 4  ;;  %s1115_s14 = int_to_ptr.vmem [resolvable:$true] %s1114_s14 }
 0x434   :  { %v878_v23 = vrot.slane %v877_v20, 2  ;;  %714 = vst [vmem:[#allocation1] sm:$0xff] %v621_v56  ;;  %710 = vrot.lane.b32.xlu2 %v709_v21, %s1342_s5 }
 0x436   :  { %v879_v59 = vadd.f32 %v878_v23, %v877_v20  ;;  %v671_v20 = vadd.f32 %v670_v17, %v1607_v49 }
 0x438   :  { %v880_v24 = vrot.slane %v879_v59, 1 }
 0x43a   :  { %v881_v27 = vadd.f32 %v880_v24, %v879_v59 }
 0x43b   :  { %v716_v29 = vld [vmem:[#allocation1 + $0x7] ss:$9 sm:$0xff] }
 0x43c   :  { %v882_v30 = vmax.f32 %v881_v27, 1e-24  ;;  %723 = vst [vmem:[#allocation1] sm:$0xff] %v1623_v28  ;;  %717 = vrot.lane.b32.xlu2 %v716_v29, %s1343_s11 }
 0x43e   :  { %1224 = vrsqrt.f32 %v882_v30  ;;  %vm889_vm6 = vweird.f32 %v882_v30 }
 0x443   :  { %v725_v32 = vld [vmem:[#allocation1 + $0x1] ss:$9 sm:$0xff] }
 0x444   :  { %v1225_v31 = vpop.eup %1224  ;;  %730 = vst [vmem:[#allocation1] sm:$0xff] %v1623_v28  ;;  %726 = vrot.lane.b32.xlu0 %v725_v32, %s1338_s26 }
 0x445   :  { %v884_v33 = vmul.f32 %v1225_v31, %v882_v30  ;;  %vm890_vm0 = vweird.f32 %v1225_v31 }
 0x446   :  { %vm891_vm7 = vmor %vm889_vm6, %vm890_vm0 }
 0x447   :  { %v885_v34 = vmul.f32 %v1225_v31, %v884_v33 }
 0x449   :  { %v886_v35 = vmul.f32 0.5, %v885_v34 }
 0x44b   :  { %v887_v36 = vsub.f32 1.5, %v886_v35  ;;  %v732_v53 = vld [vmem:[#allocation1 + $0x2] ss:$9 sm:$0xff] }
 0x44c   :  { %733 = vrot.lane.b32.xlu1 %v732_v53, %s1342_s5  ;;  %737 = vst [vmem:[#allocation1] sm:$0xff] %v1623_v28 }
 0x44d   :  { %v888_v37 = vmul.f32 %v1225_v31, %v887_v36 }
 0x44f   :  { %v892_v39 = vsel %vm891_vm7, %v1225_v31, %v888_v37 }
 0x450   :  { %v893_v13 = vmul.f32 %v892_v39, %v869_v4  ;;  %v894_v61 = vmul.f32 %v892_v39, %v870_v12 }
 0x452   :  { %1145 = vmatmul.msk.f32.vlgmr.msra.gmra.mxu3 %vm184_vm4, %v893_v13  ;;  %1147 = vmatmul.msk.f32.vlgmr.msra.gmra.mxu0 %vm184_vm4, %v893_v13 }
 0x453   :  { %1149 = vmatmul.msk.f32.vlgmr.msra.gmra.mxu1 %vm184_vm4, %v893_v13  ;;  %1151 = vmatmul.msk.f32.vlgmr.msra.gmra.mxu2 %vm184_vm4, %v893_v13  ;;  %v739_v6 = vld [vmem:[#allocation1 + $0x3] ss:$9 sm:$0xff] }
 0x454   :  { %740 = vrot.lane.b32.xlu1 %v739_v6, %s1343_s11  ;;  %745 = vst [vmem:[#allocation1] sm:$0xff] %v667_v42 }
 0x45a   :  { %1146 = vmatmul.msk.f32.gmra.mxu3 %vm184_vm4, %v894_v61  ;;  %1148 = vmatmul.msk.f32.gmra.mxu0 %vm184_vm4, %v894_v61 }
 0x45b   :  { %1150 = vmatmul.msk.f32.gmra.mxu1 %vm184_vm4, %v894_v61  ;;  %1152 = vmatmul.msk.f32.gmra.mxu2 %vm184_vm4, %v894_v61  ;;  %v1640_v43 = vld [vmem:[#allocation1 + $0x4] ss:$9 sm:$0xff] }
 0x45c   :  { %750 = vst [vmem:[#allocation1] sm:$0xff] %v667_v42 }
 0x463   :  { %v752_v44 = vld [vmem:[#allocation1 + $0x5] ss:$9 sm:$0xff] }
 0x464   :  { %757 = vst [vmem:[#allocation1] sm:$0xff] %v667_v42  ;;  %753 = vrot.lane.b32.xlu1 %v752_v44, %s1338_s26 }
 0x46b   :  { %v759_v11 = vld [vmem:[#allocation1 + $0x6] ss:$9 sm:$0xff] }
 0x46c   :  { %764 = vst [vmem:[#allocation1] sm:$0xff] %v667_v42 }
 0x473   :  { %v766_v46 = vld [vmem:[#allocation1 + $0x7] ss:$9 sm:$0xff] }
 0x476   :  { %v691_v4 = vpop.permute.xlu2 %690 }
 0x47e   :  { %v677_v60 = vpop.permute.xlu1 %676 }
 0x47f   :  { %v679_v23 = vadd.f32 %v677_v60, %v671_v20 }
 0x486   :  { %v684_v2 = vpop.permute.xlu1 %683  ;;  %v704_v5 = vpop.permute.xlu2 %703 }
 0x487   :  { %v686_v24 = vadd.f32 %v684_v2, %v679_v23 }
 0x489   :  { %v693_v30 = vadd.f32 %v691_v4, %v686_v24 }
 0x48b   :  { %v699_v34 = vadd.f32 %v1616_v3, %v693_v30 }
 0x48d   :  { %v706_v36 = vadd.f32 %v704_v5, %v699_v34 }
 0x48e   :  { %v711_v12 = vpop.permute.xlu2 %710 }
 0x48f   :  { %v713_v13 = vadd.f32 %v711_v12, %v706_v36 }
 0x496   :  { %v718_v14 = vpop.permute.xlu2 %717 }
 0x497   :  { %v720_v6 = vadd.f32 %v718_v14, %v713_v13 }
 0x4b6   :  { %v727_v44 = vpop.permute.xlu0 %726 }
 0x4be   :  { %v734_v41 = vpop.permute.xlu1 %733 }
 0x4c6   :  { %v741_v26 = vpop.permute.xlu1 %740 }
 0x4cf   :  { %v940_v45 = vpop.f32.mrf.mxu0 }
 0x4d0   :  { %v962_v0 = vpop.f32.mrf.mxu1 }
 0x4d5   :  { %v1643_v47 = vpop.f32.mrf.mxu3 }
 0x4d6   :  { %991 = vst [vmem:[#allocation1] sm:$0xff] %v1643_v47  ;;  %v984_v55 = vpop.f32.mrf.mxu2  ;;  %v754_v10 = vpop.permute.xlu1 %753  ;;  %v989_v59 = vadd.f32 %v1643_v47, %v670_v17 }
 0x4d7   :  { %v943_v18 = vpop.f32.mrf.mxu0 }
 0x4d8   :  { %v964_v50 = vpop.f32.mrf.mxu1 }
 0x4dd   :  { %v921_v48 = vpop.f32.mrf.mxu3  ;;  %v993_v22 = vld [vmem:[#allocation1 + $0x1] ss:$9 sm:$0xff] }
 0x4de   :  { %994 = vrot.lane.b32.xlu1 %v993_v22, %s1338_s26  ;;  %998 = vst [vmem:[#allocation1] sm:$0xff] %v1643_v47  ;;  %v986_v52 = vpop.f32.mrf.mxu2 }
 0x4e5   :  { %v1000_v7 = vld [vmem:[#allocation1 + $0x2] ss:$9 sm:$0xff] }
 0x4e6   :  { %1001 = vrot.lane.b32.xlu2 %v1000_v7, %s1342_s5  ;;  %1005 = vst [vmem:[#allocation1] sm:$0xff] %v1643_v47 }
 0x4ed   :  { %v1007_v9 = vld [vmem:[#allocation1 + $0x3] ss:$9 sm:$0xff] }
 0x4ee   :  { %1008 = vrot.lane.b32.xlu1 %v1007_v9, %s1343_s11  ;;  %1013 = vst [vmem:[#allocation1] sm:$0xff] %v940_v45 }
 0x4f5   :  { %v1015_v8 = vld [vmem:[#allocation1 + $0x4] ss:$9 sm:$0xff] }
 0x4f6   :  { %1018 = vst [vmem:[#allocation1] sm:$0xff] %v940_v45 }
 0x4fd   :  { %v1020_v25 = vld [vmem:[#allocation1 + $0x5] ss:$9 sm:$0xff] }
 0x4fe   :  { %1021 = vrot.lane.b32.xlu1 %v1020_v25, %s1338_s26  ;;  %1025 = vst [vmem:[#allocation1] sm:$0xff] %v940_v45 }
 0x505   :  { %v1027_v19 = vld [vmem:[#allocation1 + $0x6] ss:$9 sm:$0xff] }
 0x506   :  { %1028 = vrot.lane.b32.xlu1 %v1027_v19, %s1342_s5  ;;  %1032 = vst [vmem:[#allocation1] sm:$0xff] %v940_v45 }
 0x50d   :  { %v1034_v51 = vld [vmem:[#allocation1 + $0x7] ss:$9 sm:$0xff] }
 0x50e   :  { %1035 = vrot.lane.b32.xlu1 %v1034_v51, %s1343_s11  ;;  %1041 = vst [vmem:[#allocation1] sm:$0xff] %v964_v50 }
 0x515   :  { %v1043_v1 = vld [vmem:[#allocation1 + $0x1] ss:$9 sm:$0xff] }
 0x516   :  { %760 = vrot.lane.b32.xlu1 %v759_v11, %s1342_s5  ;;  %1044 = vrot.lane.b32.xlu2 %v1043_v1, %s1338_s26  ;;  %1048 = vst [vmem:[#allocation1] sm:$0xff] %v964_v50  ;;  %v721_v11 = vadd.f32 %v720_v6, %v1623_v28 }
 0x518   :  { %v729_v45 = vadd.f32 %v727_v44, %v721_v11 }
 0x51a   :  { %v736_v55 = vadd.f32 %v734_v41, %v729_v45 }
 0x51c   :  { %v743_v18 = vadd.f32 %v741_v26, %v736_v55 }
 0x51d   :  { %v1050_v38 = vld [vmem:[#allocation1 + $0x2] ss:$9 sm:$0xff] }
 0x51e   :  { %767 = vrot.lane.b32.xlu1 %v766_v46, %s1343_s11  ;;  %1051 = vrot.lane.b32.xlu2 %v1050_v38, %s1342_s5  ;;  %1055 = vst [vmem:[#allocation1] sm:$0xff] %v964_v50  ;;  %v749_v48 = vadd.f32 %v1640_v43, %v743_v18 }
 0x520   :  { %v756_v9 = vadd.f32 %v754_v10, %v749_v48 }
 0x525   :  { %v1057_v56 = vld [vmem:[#allocation1 + $0x3] ss:$9 sm:$0xff] }
 0x526   :  { %1058 = vrot.lane.b32.xlu2 %v1057_v56, %s1343_s11  ;;  %1063 = vst [vmem:[#allocation1] sm:$0xff] %v986_v52 }
 0x52d   :  { %v1065_v57 = vld [vmem:[#allocation1 + $0x4] ss:$9 sm:$0xff] }
 0x52e   :  { %1068 = vst [vmem:[#allocation1] sm:$0xff] %v986_v52 }
 0x535   :  { %v1070_v62 = vld [vmem:[#allocation1 + $0x5] ss:$9 sm:$0xff] }
 0x536   :  { %1071 = vrot.lane.b32.xlu2 %v1070_v62, %s1338_s26  ;;  %1075 = vst [vmem:[#allocation1] sm:$0xff] %v986_v52 }
 0x53d   :  { %v1077_v63 = vld [vmem:[#allocation1 + $0x6] ss:$9 sm:$0xff] }
 0x53e   :  { %1078 = vrot.lane.b32.xlu2 %v1077_v63, %s1342_s5  ;;  %1082 = vst [vmem:[#allocation1] sm:$0xff] %v986_v52 }
 0x540   :  { %v1002_v16 = vpop.permute.xlu2 %1001 }
 0x545   :  { %v1084_v40 = vld [vmem:[#allocation1 + $0x7] ss:$9 sm:$0xff] }
 0x546   :  { %1085 = vrot.lane.b32.xlu2 %v1084_v40, %s1343_s11 }
 0x550   :  { %v995_v58 = vpop.permute.xlu1 %994 }
 0x551   :  { %v997_v27 = vadd.f32 %v995_v58, %v989_v59 }
 0x553   :  { %v1004_v31 = vadd.f32 %v1002_v16, %v997_v27 }
 0x560   :  { %v1009_v15 = vpop.permute.xlu1 %1008 }
 0x561   :  { %v1011_v32 = vadd.f32 %v1009_v15, %v1004_v31 }
 0x563   :  { %v1017_v35 = vadd.f32 %v1015_v8, %v1011_v32  ;;  %v1089_v8 = vlaneseq }
 0x565   :  { %v1090_v38 = vshrl.u32 %v1089_v8, 7 }
 0x567   :  { %vm1091_vm4 = vcmp.eq.s32.totalorder %v1090_v38, 0  ;;  %vm1099_vm8 = vcmp.eq.s32.totalorder %v1090_v38, 1 }
 0x570   :  { %v1022_v54 = vpop.permute.xlu1 %1021  ;;  %v1045_v21 = vpop.permute.xlu2 %1044 }
 0x571   :  { %v1024_v53 = vadd.f32 %v1022_v54, %v1017_v35 }
 0x578   :  { %v1029_v29 = vpop.permute.xlu1 %1028  ;;  %v1052_v33 = vpop.permute.xlu2 %1051 }
 0x579   :  { %v1031_v39 = vadd.f32 %v1029_v29, %v1024_v53 }
 0x580   :  { %v1036_v37 = vpop.permute.xlu1 %1035  ;;  %v1059_v42 = vpop.permute.xlu2 %1058 }
 0x581   :  { %v1038_v49 = vadd.f32 %v1036_v37, %v1031_v39 }
 0x583   :  { %v1039_v61 = vadd.f32 %v1038_v49, %v964_v50 }
 0x585   :  { %v1047_v0 = vadd.f32 %v1045_v21, %v1039_v61 }
 0x587   :  { %v1054_v3 = vadd.f32 %v1052_v33, %v1047_v0 }
 0x588   :  { %v761_v46 = vpop.permute.xlu1 %760 }
 0x589   :  { %v1061_v22 = vadd.f32 %v1059_v42, %v1054_v3  ;;  %v763_v19 = vadd.f32 %v761_v46, %v756_v9 }
 0x58b   :  { %v1067_v51 = vadd.f32 %v1065_v57, %v1061_v22 }
 0x590   :  { %v1072_v47 = vpop.permute.xlu2 %1071  ;;  %v768_v25 = vpop.permute.xlu1 %767 }
 0x591   :  { %v770_v50 = vadd.f32 %v768_v25, %v763_v19  ;;  %v1074_v1 = vadd.f32 %v1072_v47, %v1067_v51 }
 0x593   :  { %v1095_v56 = vperm.slane %v770_v50, 0 }
 0x595   :  { %v1097_v43 = vsel %vm1091_vm4, %v1095_v56, 0.0 }
 0x598   :  { %v1079_v7 = vpop.permute.xlu2 %1078 }
 0x599   :  { %v1081_v28 = vadd.f32 %v1079_v7, %v1074_v1 }
 0x5a0   :  { %v1086_v52 = vpop.permute.xlu2 %1085 }
 0x5a1   :  { %v1088_v60 = vadd.f32 %v1086_v52, %v1081_v28 }
 0x5a3   :  { %v1103_v62 = vperm.slane %v1088_v60, 0 }
 0x5a5   :  { %v1105_v63 = vsel %vm1099_vm8, %v1103_v62, 0.0 }
 0x5a6   :  { %v1106_v57 = vadd.f32 %v1105_v63, %v1097_v43 }
 0x5a8   :  { %1108 = vst.msk [vmem:[#allocation8] sm:$0x3] %vm1107_vm9, %v1106_v57 }
 0x5a9   :  { %1119 = dma.vmem_to_hbm [thread:$0]  %s1115_s14, 32, %s1117_s17, [#allocation4]  }
 0x5aa   :  { %1326 = dma.done.wait [#allocation4], 32  }
 0x5ab   :  { %1327 = vsyncadd [#allocation4], 4294967264 }
 0x5ac   :  { %1124 = vsyncpa [#allocation3], 1 }
 0x5ad   :  { %1125 = vsyncpa [#allocation6], 1 }
 0x5ae   :  { %1126 = vsyncpa [#allocation4], 1 }

</bundles_post_ra>
